<compile_context>
chip_gen: v7x
topology: tpu7x:2x2x1
jax: 0.10.0
libtpu: 0.0.40
codegen_flags: <defaults>
</compile_context>

<pallas_src>
import jax
import jax.numpy as jnp
from jax.experimental import pallas as pl
from jax.experimental.pallas import tpu as pltpu

INV_SQRT2 = 0.7071067811865476
REVIN_EPS = 1e-5
LN_EPS = 1e-5


def _make_kernel(L, C, H, P):
    """Builds the fused kernel for static (seq_len, enc_in, hidden_size, pred_len)."""
    CL = C * L                 # lanes of one "all channels" activation
    CL3 = 3 * CL
    CH4 = C * 4 * H
    CH = C * H
    PC = P * C
    # Column offsets inside the packed weight slabs (must match _fold_params).
    A_WZ, A_W1 = 0, CL3
    A_BZZ = A_W1 + CH4         # interleaved lanes  -> per-channel time-mean, interleaved
    A_BHH = A_BZZ + CL         # channel-major lanes -> per-channel mean, channel-major
    A_BZO = A_BHH + CL         # interleaved lanes  -> per-channel time-mean, output lanes
    C_W3, C_B22 = 0, PC
    V_BG = 0
    V_B1 = V_BG + CL3
    V_AW = V_B1 + CH4
    V_AB = V_AW + CL
    V_B2 = V_AB + CL
    V_B3 = V_B2 + CH
    V_IAW = V_B3 + PC
    V_ABO = V_IAW + PC

    def kernel(x_ref, wA_ref, wB_ref, wC_ref, vec_ref, o_ref):
        f32 = jnp.float32
        x = x_ref[...]                                   # (rows, L*C), lane = l*C + c

        # ---- RevIN 'norm': per-channel time mean/var via MXU segment-mean matmuls ----
        mean_b = jnp.dot(x, wA_ref[:, A_BZZ:A_BZZ + CL], preferred_element_type=f32)
        xc = x - mean_b
        xsq = xc * xc
        var_b = jnp.dot(xsq, wA_ref[:, A_BZZ:A_BZZ + CL], preferred_element_type=f32)
        z = (xc * jax.lax.rsqrt(var_b + REVIN_EPS)
             * vec_ref[:, V_AW:V_AW + CL] + vec_ref[:, V_AB:V_AB + CL])
        # Denorm statistics broadcast straight into the (p-major, c-minor) output lanes.
        mean_o = jnp.dot(x, wA_ref[:, A_BZO:A_BZO + PC], preferred_element_type=f32)
        stdev_o = jnp.sqrt(
            jnp.dot(xsq, wA_ref[:, A_BZO:A_BZO + PC], preferred_element_type=f32)
            + REVIN_EPS)

        # ---- de-interleave + Haar SWT + gate_proj fused into one MXU matmul ----
        g = (jnp.dot(z, wA_ref[:, A_WZ:A_WZ + CL3], preferred_element_type=f32)
             + vec_ref[:, V_BG:V_BG + CL3])
        cA = g[:, 0:CL]                     # channel-major (c*L + l); 128-aligned slices
        ga = g[:, CL:2 * CL]
        gb = g[:, 2 * CL:CL3]
        h = ga * jax.nn.sigmoid(gb) + cA    # dropout == identity (inference)

        # ---- GatedMLP LayerNorm over each channel's L lanes (segment mean on MXU) ----
        hm_b = jnp.dot(h, wA_ref[:, A_BHH:A_BHH + CL], preferred_element_type=f32)
        hc = h - hm_b
        hv_b = jnp.dot(hc * hc, wA_ref[:, A_BHH:A_BHH + CL], preferred_element_type=f32)
        hn = hc * jax.lax.rsqrt(hv_b + LN_EPS)
        # (LN affine + the ISWT 1/sqrt(2) identity are folded into w1/b1 host-side.)

        # ---- head: Linear -> LeakyReLU(0.1) -> Linear -> LayerNorm -> Linear ----
        h1 = (jnp.dot(hn, wA_ref[:, A_W1:A_W1 + CH4], preferred_element_type=f32)
              + vec_ref[:, V_B1:V_B1 + CH4])
        h1 = jnp.where(h1 > 0, h1, 0.1 * h1)
        h2 = (jnp.dot(h1, wB_ref[...], preferred_element_type=f32)
              + vec_ref[:, V_B2:V_B2 + CH])
        m2_b = jnp.dot(h2, wC_ref[:, C_B22:C_B22 + CH], preferred_element_type=f32)
        h2c = h2 - m2_b
        v2_b = jnp.dot(h2c * h2c, wC_ref[:, C_B22:C_B22 + CH], preferred_element_type=f32)
        h3 = h2c * jax.lax.rsqrt(v2_b + LN_EPS)
        # head-LN affine folded into w3/b3; w3 also permutes output lanes to (p*C + c).
        y = (jnp.dot(h3, wC_ref[:, C_W3:C_W3 + PC], preferred_element_type=f32)
             + vec_ref[:, V_B3:V_B3 + PC])

        # ---- RevIN 'denorm', written directly in the native (B, P, C) lane order ----
        o_ref[...] = ((y - vec_ref[:, V_ABO:V_ABO + PC])
                      * vec_ref[:, V_IAW:V_IAW + PC] * stdev_o + mean_o)

    return kernel


def init_params(key, seq_len, enc_in, hidden_size, pred_len):
    ks = jax.random.split(key, 12)
    L, H, P = seq_len, hidden_size, pred_len

    def dense(k, fi, fo):
        return jax.random.normal(k, (fi, fo), jnp.float32) / jnp.sqrt(float(fi))

    return dict(
        rev_w=1.0 + 0.1 * jax.random.normal(ks[0], (enc_in,), jnp.float32),
        rev_b=0.05 * jax.random.normal(ks[1], (enc_in,), jnp.float32),
        # gate_proj: torch Linear(L, 2L); stored pre-transposed & chunked (wa | wb).
        wa=dense(ks[2], L, L), ba=0.02 * jax.random.normal(ks[3], (L,), jnp.float32),
        wb=dense(ks[4], L, L), bb=0.02 * jax.random.normal(ks[5], (L,), jnp.float32),
        ln_g=jnp.ones((L,), jnp.float32), ln_b=jnp.zeros((L,), jnp.float32),
        # head
        w1=dense(ks[6], L, 4 * H), b1=0.02 * jax.random.normal(ks[7], (4 * H,), jnp.float32),
        w2=dense(ks[8], 4 * H, H), b2=0.02 * jax.random.normal(ks[9], (H,), jnp.float32),
        hln_g=jnp.ones((H,), jnp.float32), hln_b=jnp.zeros((H,), jnp.float32),
        w3=dense(ks[10], H, P), b3=0.02 * jax.random.normal(ks[11], (P,), jnp.float32),
    )


def _fold_params(p):
    """Host-side algebraic folding + packing of the module parameters into 4 slabs."""
    HP = jax.lax.Precision.HIGHEST
    f32 = jnp.float32
    L = p["wa"].shape[0]
    C = p["rev_w"].shape[0]
    H = p["w2"].shape[1]
    P = p["w3"].shape[1]
    eyeL = jnp.eye(L, dtype=f32)
    eyeC = jnp.eye(C, dtype=f32)

    # Haar SWT level-1 ('haar', periodization):  cA = z @ haar,
    #   cA[t] = (z[t] + z[(t+1) % L]) / sqrt(2)
    haar = (eyeL + jnp.roll(eyeL, 1, axis=0)) * INV_SQRT2
    hwa = jnp.matmul(haar, p["wa"], precision=HP)      # Haar folded into gate_a weights
    hwb = jnp.matmul(haar, p["wb"], precision=HP)      # Haar folded into gate_b weights
    # Fused [cA | gate_a | gate_b]: rows = interleaved input lanes (l*C + c),
    # columns = three channel-major groups (s*C*L + c*L + j).
    Ws = jnp.stack([haar, hwa, hwb], axis=0)                          # (3, L, L)
    Wz = jnp.einsum("slj,cd->lcsdj", Ws, eyeC).reshape(L * C, 3 * C * L)
    bg = jnp.concatenate([jnp.zeros((C * L,), f32),
                          jnp.tile(p["ba"], C), jnp.tile(p["bb"], C)])

    # GatedMLP LayerNorm affine and the ISWT identity (recon == cA_ln / sqrt(2),
    # because the module passes (cA_restored, cA_restored) to iswt) fold into w1/b1.
    w1f = (p["ln_g"] * INV_SQRT2)[:, None] * p["w1"]
    b1f = p["b1"] + jnp.matmul(p["ln_b"] * INV_SQRT2, p["w1"], precision=HP)
    W1 = jnp.kron(eyeC, w1f)                                           # (C*L, C*4H)
    b1 = jnp.tile(b1f, C)
    W2 = jnp.kron(eyeC, p["w2"])                                       # (C*4H, C*H)
    b2 = jnp.tile(p["b2"], C)
    # Head LayerNorm affine folds into w3/b3; W3 additionally permutes the output
    # lanes to (p*C + c) so the kernel writes the native (B, P, C) layout directly.
    w3f = p["hln_g"][:, None] * p["w3"]
    b3f = p["b3"] + jnp.matmul(p["hln_b"], p["w3"], precision=HP)
    W3 = jnp.einsum("ip,cd->cipd", w3f, eyeC).reshape(C * H, P * C)
    b3 = jnp.repeat(b3f, C)

    # Segment-mean + broadcast matrices so every reduction runs on the MXU.
    M = jnp.tile(eyeC, (L, 1)) / L                     # interleaved lanes -> channel mean
    S1 = jnp.kron(eyeC, jnp.ones((L, 1), f32)) / L     # channel-major(L) -> channel mean
    S2 = jnp.kron(eyeC, jnp.ones((H, 1), f32)) / H     # channel-major(H) -> channel mean
    MtZ = jnp.tile(eyeC, (1, L))                       # channel -> interleaved lanes
    St1 = jnp.kron(eyeC, jnp.ones((1, L), f32))        # channel -> channel-major(L)
    St2 = jnp.kron(eyeC, jnp.ones((1, H), f32))        # channel -> channel-major(H)
    MtO = jnp.tile(eyeC, (1, P))                       # channel -> output (p*C + c)
    B_zz = jnp.matmul(M, MtZ, precision=HP)            # (L*C, L*C)
    B_zo = jnp.matmul(M, MtO, precision=HP)            # (L*C, P*C)
    B_hh = jnp.matmul(S1, St1, precision=HP)           # (C*L, C*L)
    B_22 = jnp.matmul(S2, St2, precision=HP)           # (C*H, C*H)

    aw_i = jnp.tile(p["rev_w"], L)                                  # interleaved lanes
    ab_i = jnp.tile(p["rev_b"], L)
    iaw_o = jnp.tile(1.0 / (p["rev_w"] + REVIN_EPS ** 2), P)        # denorm, output lanes
    ab_o = jnp.tile(p["rev_b"], P)

    wA = jnp.concatenate([Wz, W1, B_zz, B_hh, B_zo], axis=1)        # (L*C, 928) for L=32,C=4,H=16,P=8
    wB = W2                                                         # (C*4H, C*H)
    wC = jnp.concatenate([W3, B_22], axis=1)                        # (C*H, P*C + C*H)
    vec = jnp.concatenate([bg, b1, aw_i, ab_i, b2, b3, iaw_o, ab_o])[None, :]
    return wA, wB, wC, vec


@jax.jit
def model_forward(x, p):
    B, L, C = x.shape
    H = p["w2"].shape[1]
    P = p["w3"].shape[1]

    # Native layout in, native layout out: (B, L, C) -> (B, L*C) is a free contiguous
    # reshape (no wrapper HBM transpose pass); channels stay in the lane axis.
    x_flat = x.reshape(B, L * C).astype(jnp.float32)
    wA, wB, wC, vec = _fold_params(p)

    # Grid sizing: each row carries all C channels (L*C lanes), so `cap` batch
    # rows/step == cap*C (batch, channel) rows of the previous layout.  4096 // C
    # keeps per-step VMEM (I/O double-buffers + spilled intermediates) at a few MiB,
    # inside even v5e's 16 MiB default scoped limit, so no vmem_limit_bytes needed.
    # Even step count lets v7x's two TensorCores split the "parallel" axis evenly.
    cap = max(64, min(2048, 4096 // max(C, 1)))
    cap -= cap % 8
    if B <= 8:
        n_steps = 1
    elif B <= 2 * cap:
        n_steps = 2
    else:
        n_steps = 2 * (-(-B // (2 * cap)))
    row_block = max(8, ((-(-B // n_steps)) + 7) // 8 * 8)
    B_pad = n_steps * row_block
    if B_pad != B:
        x_flat = jnp.pad(x_flat, ((0, B_pad - B), (0, 0)))   # padded rows sliced away below

    rep = lambda w: pl.BlockSpec(w.shape, lambda i: (0, 0))
    out = pl.pallas_call(
        _make_kernel(L, C, H, P),
        out_shape=jax.ShapeDtypeStruct((B_pad, P * C), jnp.float32),
        grid=(n_steps,),
        in_specs=[pl.BlockSpec((row_block, L * C), lambda i: (i, 0)),
                  rep(wA), rep(wB), rep(wC), rep(vec)],
        out_specs=pl.BlockSpec((row_block, P * C), lambda i: (i, 0)),
        compiler_params=pltpu.CompilerParams(dimension_semantics=("parallel",)),
    )(x_flat, wA, wB, wC, vec)

    # Output lanes are already (p-major, c-minor) == native (B, P, C) memory order.
    return out[:B].reshape(B, P, C)


def reference_forward(x, p):
    """Pure-JAX mirror of the PyTorch forward (unfolded params, for checking)."""
    B, L, C = x.shape
    mean = x.mean(axis=1, keepdims=True)
    var = ((x - mean) ** 2).mean(axis=1, keepdims=True)
    stdev = jnp.sqrt(var + REVIN_EPS)
    z = (x - mean) / stdev * p["rev_w"] + p["rev_b"]            # (B, L, C)
    zr = jnp.transpose(z, (0, 2, 1)).reshape(B * C, L)
    cA = (zr + jnp.roll(zr, -1, axis=1)) * INV_SQRT2
    ga = cA @ p["wa"] + p["ba"]
    gb = cA @ p["wb"] + p["bb"]
    h = ga * jax.nn.sigmoid(gb) + cA
    hm = h.mean(axis=-1, keepdims=True)
    hv = ((h - hm) ** 2).mean(axis=-1, keepdims=True)
    cA_ln = (h - hm) / jnp.sqrt(hv + LN_EPS) * p["ln_g"] + p["ln_b"]
    cD = cA_ln
    recon = (cA_ln + cD + jnp.roll(cA_ln, 1, axis=1) - jnp.roll(cD, 1, axis=1)) * (0.5 * INV_SQRT2)
    h1 = recon @ p["w1"] + p["b1"]
    h1 = jnp.where(h1 > 0, h1, 0.1 * h1)
    h2 = h1 @ p["w2"] + p["b2"]
    m2 = h2.mean(axis=-1, keepdims=True)
    v2 = ((h2 - m2) ** 2).mean(axis=-1, keepdims=True)
    h3 = (h2 - m2) / jnp.sqrt(v2 + LN_EPS) * p["hln_g"] + p["hln_b"]
    y = h3 @ p["w3"] + p["b3"]                                   # (B*C, P)
    y = jnp.transpose(y.reshape(B, C, -1), (0, 2, 1))            # (B, P, C)
    return (y - p["rev_b"]) / (p["rev_w"] + REVIN_EPS ** 2) * stdev + mean


if __name__ == "__main__":
    # configs: seq_len=32, pred_len=8, enc_in=4, hidden_size=16,
    #          swt_level=1, wavelet='haar', batch=2
    B, L, C, H, P = 2, 32, 4, 16, 8

    key = jax.random.PRNGKey(0)
    k_par, k_x = jax.random.split(key)
    params = init_params(k_par, seq_len=L, enc_in=C, hidden_size=H, pred_len=P)
    x = jax.random.normal(k_x, (B, L, C), jnp.float32)

    out = jax.block_until_ready(model_forward(x, params))
    ref = jax.block_until_ready(reference_forward(x, params))
    assert out.shape == (B, P, C), out.shape
    err = float(jnp.max(jnp.abs(out - ref)))
    assert err < 2e-4, err

    print("KERNEL_OK")
</pallas_src>

<mosaic_0001>
module attributes {stable_mosaic.version = 11 : i64} {
  func.func @kernel(%arg0: i32, %arg1: memref<8x128xf32, #tpu.memory_space<vmem>>, %arg2: memref<128x928xf32, #tpu.memory_space<vmem>>, %arg3: memref<256x64xf32, #tpu.memory_space<vmem>>, %arg4: memref<64x96xf32, #tpu.memory_space<vmem>>, %arg5: memref<1x1056xf32, #tpu.memory_space<vmem>>, %arg6: memref<8x32xf32, #tpu.memory_space<vmem>>) attributes {dimension_semantics = [#tpu.dimension_semantics<parallel>], iteration_bounds = array<i64: 1>, scalar_prefetch = 0 : i64, scratch_operands = 0 : i64, tpu.core_type = #tpu.core_type<tc>, window_params = [{transform_indices = @transform_0, window_bounds = array<i64: 8, 128>}, {pipeline_mode = #tpu.pipeline_mode<synchronous>, transform_indices = @transform_1, window_bounds = array<i64: 128, 928>}, {pipeline_mode = #tpu.pipeline_mode<synchronous>, transform_indices = @transform_2, window_bounds = array<i64: 256, 64>}, {pipeline_mode = #tpu.pipeline_mode<synchronous>, transform_indices = @transform_3, window_bounds = array<i64: 64, 96>}, {pipeline_mode = #tpu.pipeline_mode<synchronous>, transform_indices = @transform_4, window_bounds = array<i64: 1, 1056>}, {transform_indices = @transform_5, window_bounds = array<i64: 8, 32>}]} {
    %c0 = arith.constant 0 : index
    %c0_0 = arith.constant 0 : index
    %0 = vector.load %arg1[%c0, %c0_0] : memref<8x128xf32, #tpu.memory_space<vmem>>, vector<8x128xf32>
    %c0_1 = arith.constant 0 : index
    %c640 = arith.constant 640 : index
    %1 = vector.load %arg2[%c0_1, %c640] : memref<128x928xf32, #tpu.memory_space<vmem>>, vector<128x128xf32>
    %cst = arith.constant dense<0.000000e+00> : vector<8x128xf32>
    %2 = tpu.matmul %0, %1, %cst {dimension_numbers = #tpu.dot_dimension_numbers<[1], [0], [0], [1], [0, 0, 1, 1], [], []>} : vector<8x128xf32>, vector<128x128xf32>, vector<8x128xf32> -> vector<8x128xf32>
    %3 = arith.subf %0, %2 : vector<8x128xf32>
    %4 = arith.mulf %3, %3 : vector<8x128xf32>
    %c0_2 = arith.constant 0 : index
    %c640_3 = arith.constant 640 : index
    %5 = vector.load %arg2[%c0_2, %c640_3] : memref<128x928xf32, #tpu.memory_space<vmem>>, vector<128x128xf32>
    %cst_4 = arith.constant dense<0.000000e+00> : vector<8x128xf32>
    %6 = tpu.matmul %4, %5, %cst_4 {dimension_numbers = #tpu.dot_dimension_numbers<[1], [0], [0], [1], [0, 0, 1, 1], [], []>} : vector<8x128xf32>, vector<128x128xf32>, vector<8x128xf32> -> vector<8x128xf32>
    %cst_5 = arith.constant 9.99999974E-6 : f32
    %7 = vector.broadcast %cst_5 : f32 to vector<8x128xf32>
    %8 = arith.addf %6, %7 : vector<8x128xf32>
    %9 = math.rsqrt %8 : vector<8x128xf32>
    %10 = arith.mulf %3, %9 : vector<8x128xf32>
    %c0_6 = arith.constant 0 : index
    %c640_7 = arith.constant 640 : index
    %11 = vector.load %arg5[%c0_6, %c640_7] : memref<1x1056xf32, #tpu.memory_space<vmem>>, vector<1x128xf32>
    %12 = vector.broadcast %11 : vector<1x128xf32> to vector<8x128xf32>
    %13 = arith.mulf %10, %12 : vector<8x128xf32>
    %c0_8 = arith.constant 0 : index
    %c768 = arith.constant 768 : index
    %14 = vector.load %arg5[%c0_8, %c768] : memref<1x1056xf32, #tpu.memory_space<vmem>>, vector<1x128xf32>
    %15 = vector.broadcast %14 : vector<1x128xf32> to vector<8x128xf32>
    %16 = arith.addf %13, %15 : vector<8x128xf32>
    %c0_9 = arith.constant 0 : index
    %c896 = arith.constant 896 : index
    %17 = vector.load %arg2[%c0_9, %c896] : memref<128x928xf32, #tpu.memory_space<vmem>>, vector<128x32xf32>
    %cst_10 = arith.constant dense<0.000000e+00> : vector<8x32xf32>
    %18 = tpu.matmul %0, %17, %cst_10 {dimension_numbers = #tpu.dot_dimension_numbers<[1], [0], [0], [1], [0, 0, 1, 1], [], []>} : vector<8x128xf32>, vector<128x32xf32>, vector<8x32xf32> -> vector<8x32xf32>
    %c0_11 = arith.constant 0 : index
    %c896_12 = arith.constant 896 : index
    %19 = vector.load %arg2[%c0_11, %c896_12] : memref<128x928xf32, #tpu.memory_space<vmem>>, vector<128x32xf32>
    %cst_13 = arith.constant dense<0.000000e+00> : vector<8x32xf32>
    %20 = tpu.matmul %4, %19, %cst_13 {dimension_numbers = #tpu.dot_dimension_numbers<[1], [0], [0], [1], [0, 0, 1, 1], [], []>} : vector<8x128xf32>, vector<128x32xf32>, vector<8x32xf32> -> vector<8x32xf32>
    %cst_14 = arith.constant 9.99999974E-6 : f32
    %21 = vector.broadcast %cst_14 : f32 to vector<8x32xf32>
    %22 = arith.addf %20, %21 : vector<8x32xf32>
    %23 = math.sqrt %22 : vector<8x32xf32>
    %c0_15 = arith.constant 0 : index
    %c0_16 = arith.constant 0 : index
    %24 = vector.load %arg2[%c0_15, %c0_16] : memref<128x928xf32, #tpu.memory_space<vmem>>, vector<128x384xf32>
    %cst_17 = arith.constant dense<0.000000e+00> : vector<8x384xf32>
    %25 = tpu.matmul %16, %24, %cst_17 {dimension_numbers = #tpu.dot_dimension_numbers<[1], [0], [0], [1], [0, 0, 1, 1], [], []>} : vector<8x128xf32>, vector<128x384xf32>, vector<8x384xf32> -> vector<8x384xf32>
    %c0_18 = arith.constant 0 : index
    %c0_19 = arith.constant 0 : index
    %26 = vector.load %arg5[%c0_18, %c0_19] : memref<1x1056xf32, #tpu.memory_space<vmem>>, vector<1x384xf32>
    %27 = vector.broadcast %26 : vector<1x384xf32> to vector<8x384xf32>
    %28 = arith.addf %25, %27 : vector<8x384xf32>
    %29 = vector.extract_strided_slice %28 {offsets = [0, 0], sizes = [8, 128], strides = [1, 1]} : vector<8x384xf32> to vector<8x128xf32>
    %30 = vector.extract_strided_slice %28 {offsets = [0, 128], sizes = [8, 128], strides = [1, 1]} : vector<8x384xf32> to vector<8x128xf32>
    %31 = vector.extract_strided_slice %28 {offsets = [0, 256], sizes = [8, 128], strides = [1, 1]} : vector<8x384xf32> to vector<8x128xf32>
    %32 = arith.negf %31 : vector<8x128xf32>
    %33 = math.exp %32 : vector<8x128xf32>
    %cst_20 = arith.constant 1.000000e+00 : f32
    %34 = vector.broadcast %cst_20 : f32 to vector<8x128xf32>
    %35 = arith.addf %34, %33 : vector<8x128xf32>
    %36 = arith.divf %34, %35 : vector<8x128xf32>
    %37 = arith.mulf %30, %36 : vector<8x128xf32>
    %38 = arith.addf %37, %29 : vector<8x128xf32>
    %c0_21 = arith.constant 0 : index
    %c768_22 = arith.constant 768 : index
    %39 = vector.load %arg2[%c0_21, %c768_22] : memref<128x928xf32, #tpu.memory_space<vmem>>, vector<128x128xf32>
    %cst_23 = arith.constant dense<0.000000e+00> : vector<8x128xf32>
    %40 = tpu.matmul %38, %39, %cst_23 {dimension_numbers = #tpu.dot_dimension_numbers<[1], [0], [0], [1], [0, 0, 1, 1], [], []>} : vector<8x128xf32>, vector<128x128xf32>, vector<8x128xf32> -> vector<8x128xf32>
    %41 = arith.subf %38, %40 : vector<8x128xf32>
    %42 = arith.mulf %41, %41 : vector<8x128xf32>
    %c0_24 = arith.constant 0 : index
    %c768_25 = arith.constant 768 : index
    %43 = vector.load %arg2[%c0_24, %c768_25] : memref<128x928xf32, #tpu.memory_space<vmem>>, vector<128x128xf32>
    %cst_26 = arith.constant dense<0.000000e+00> : vector<8x128xf32>
    %44 = tpu.matmul %42, %43, %cst_26 {dimension_numbers = #tpu.dot_dimension_numbers<[1], [0], [0], [1], [0, 0, 1, 1], [], []>} : vector<8x128xf32>, vector<128x128xf32>, vector<8x128xf32> -> vector<8x128xf32>
    %cst_27 = arith.constant 9.99999974E-6 : f32
    %45 = vector.broadcast %cst_27 : f32 to vector<8x128xf32>
    %46 = arith.addf %44, %45 : vector<8x128xf32>
    %47 = math.rsqrt %46 : vector<8x128xf32>
    %48 = arith.mulf %41, %47 : vector<8x128xf32>
    %c0_28 = arith.constant 0 : index
    %c384 = arith.constant 384 : index
    %49 = vector.load %arg2[%c0_28, %c384] : memref<128x928xf32, #tpu.memory_space<vmem>>, vector<128x256xf32>
    %cst_29 = arith.constant dense<0.000000e+00> : vector<8x256xf32>
    %50 = tpu.matmul %48, %49, %cst_29 {dimension_numbers = #tpu.dot_dimension_numbers<[1], [0], [0], [1], [0, 0, 1, 1], [], []>} : vector<8x128xf32>, vector<128x256xf32>, vector<8x256xf32> -> vector<8x256xf32>
    %c0_30 = arith.constant 0 : index
    %c384_31 = arith.constant 384 : index
    %51 = vector.load %arg5[%c0_30, %c384_31] : memref<1x1056xf32, #tpu.memory_space<vmem>>, vector<1x256xf32>
    %52 = vector.broadcast %51 : vector<1x256xf32> to vector<8x256xf32>
    %53 = arith.addf %50, %52 : vector<8x256xf32>
    %cst_32 = arith.constant 0.000000e+00 : f32
    %54 = vector.broadcast %cst_32 : f32 to vector<8x256xf32>
    %55 = arith.cmpf ogt, %53, %54 : vector<8x256xf32>
    %cst_33 = arith.constant 1.000000e-01 : f32
    %56 = vector.broadcast %cst_33 : f32 to vector<8x256xf32>
    %57 = arith.mulf %56, %53 : vector<8x256xf32>
    %58 = arith.select %55, %53, %57 : vector<8x256xi1>, vector<8x256xf32>
    %c0_34 = arith.constant 0 : index
    %c0_35 = arith.constant 0 : index
    %59 = vector.load %arg3[%c0_34, %c0_35] : memref<256x64xf32, #tpu.memory_space<vmem>>, vector<256x64xf32>
    %cst_36 = arith.constant dense<0.000000e+00> : vector<8x64xf32>
    %60 = tpu.matmul %58, %59, %cst_36 {dimension_numbers = #tpu.dot_dimension_numbers<[1], [0], [0], [1], [0, 0, 1, 1], [], []>} : vector<8x256xf32>, vector<256x64xf32>, vector<8x64xf32> -> vector<8x64xf32>
    %c0_37 = arith.constant 0 : index
    %c896_38 = arith.constant 896 : index
    %61 = vector.load %arg5[%c0_37, %c896_38] : memref<1x1056xf32, #tpu.memory_space<vmem>>, vector<1x64xf32>
    %62 = vector.broadcast %61 : vector<1x64xf32> to vector<8x64xf32>
    %63 = arith.addf %60, %62 : vector<8x64xf32>
    %c0_39 = arith.constant 0 : index
    %c32 = arith.constant 32 : index
    %64 = vector.load %arg4[%c0_39, %c32] : memref<64x96xf32, #tpu.memory_space<vmem>>, vector<64x64xf32>
    %cst_40 = arith.constant dense<0.000000e+00> : vector<8x64xf32>
    %65 = tpu.matmul %63, %64, %cst_40 {dimension_numbers = #tpu.dot_dimension_numbers<[1], [0], [0], [1], [0, 0, 1, 1], [], []>} : vector<8x64xf32>, vector<64x64xf32>, vector<8x64xf32> -> vector<8x64xf32>
    %66 = arith.subf %63, %65 : vector<8x64xf32>
    %67 = arith.mulf %66, %66 : vector<8x64xf32>
    %c0_41 = arith.constant 0 : index
    %c32_42 = arith.constant 32 : index
    %68 = vector.load %arg4[%c0_41, %c32_42] : memref<64x96xf32, #tpu.memory_space<vmem>>, vector<64x64xf32>
    %cst_43 = arith.constant dense<0.000000e+00> : vector<8x64xf32>
    %69 = tpu.matmul %67, %68, %cst_43 {dimension_numbers = #tpu.dot_dimension_numbers<[1], [0], [0], [1], [0, 0, 1, 1], [], []>} : vector<8x64xf32>, vector<64x64xf32>, vector<8x64xf32> -> vector<8x64xf32>
    %cst_44 = arith.constant 9.99999974E-6 : f32
    %70 = vector.broadcast %cst_44 : f32 to vector<8x64xf32>
    %71 = arith.addf %69, %70 : vector<8x64xf32>
    %72 = math.rsqrt %71 : vector<8x64xf32>
    %73 = arith.mulf %66, %72 : vector<8x64xf32>
    %c0_45 = arith.constant 0 : index
    %c0_46 = arith.constant 0 : index
    %74 = vector.load %arg4[%c0_45, %c0_46] : memref<64x96xf32, #tpu.memory_space<vmem>>, vector<64x32xf32>
    %cst_47 = arith.constant dense<0.000000e+00> : vector<8x32xf32>
    %75 = tpu.matmul %73, %74, %cst_47 {dimension_numbers = #tpu.dot_dimension_numbers<[1], [0], [0], [1], [0, 0, 1, 1], [], []>} : vector<8x64xf32>, vector<64x32xf32>, vector<8x32xf32> -> vector<8x32xf32>
    %c0_48 = arith.constant 0 : index
    %c960 = arith.constant 960 : index
    %76 = vector.load %arg5[%c0_48, %c960] : memref<1x1056xf32, #tpu.memory_space<vmem>>, vector<1x32xf32>
    %77 = vector.broadcast %76 : vector<1x32xf32> to vector<8x32xf32>
    %78 = arith.addf %75, %77 : vector<8x32xf32>
    %c0_49 = arith.constant 0 : index
    %c1024 = arith.constant 1024 : index
    %79 = vector.load %arg5[%c0_49, %c1024] : memref<1x1056xf32, #tpu.memory_space<vmem>>, vector<1x32xf32>
    %80 = vector.broadcast %79 : vector<1x32xf32> to vector<8x32xf32>
    %81 = arith.subf %78, %80 : vector<8x32xf32>
    %c0_50 = arith.constant 0 : index
    %c992 = arith.constant 992 : index
    %82 = vector.load %arg5[%c0_50, %c992] : memref<1x1056xf32, #tpu.memory_space<vmem>>, vector<1x32xf32>
    %83 = vector.broadcast %82 : vector<1x32xf32> to vector<8x32xf32>
    %84 = arith.mulf %81, %83 : vector<8x32xf32>
    %85 = arith.mulf %84, %23 : vector<8x32xf32>
    %86 = arith.addf %85, %18 : vector<8x32xf32>
    %c0_51 = arith.constant 0 : index
    %c0_52 = arith.constant 0 : index
    %87 = vector.load %arg6[%c0_51, %c0_52] : memref<8x32xf32, #tpu.memory_space<vmem>>, vector<8x32xf32>
    tpu.vector_store %arg6[%c0_51, %c0_52], %86 {strides = array<i32>} : memref<8x32xf32, #tpu.memory_space<vmem>>, vector<8x32xf32>,
    return
  }
  func.func @transform_0(%arg0: i32) -> (i32, i32) {
    %c0_i32 = arith.constant 0 : i32
    %c0_i32_0 = arith.constant 0 : i32
    return %arg0, %c0_i32 : i32, i32
  }
  func.func @transform_1(%arg0: i32) -> (i32, i32) {
    %c0_i32 = arith.constant 0 : i32
    %c0_i32_0 = arith.constant 0 : i32
    %c0_i32_1 = arith.constant 0 : i32
    return %c0_i32, %c0_i32_0 : i32, i32
  }
  func.func @transform_2(%arg0: i32) -> (i32, i32) {
    %c0_i32 = arith.constant 0 : i32
    %c0_i32_0 = arith.constant 0 : i32
    %c0_i32_1 = arith.constant 0 : i32
    return %c0_i32, %c0_i32_0 : i32, i32
  }
  func.func @transform_3(%arg0: i32) -> (i32, i32) {
    %c0_i32 = arith.constant 0 : i32
    %c0_i32_0 = arith.constant 0 : i32
    %c0_i32_1 = arith.constant 0 : i32
    return %c0_i32, %c0_i32_0 : i32, i32
  }
  func.func @transform_4(%arg0: i32) -> (i32, i32) {
    %c0_i32 = arith.constant 0 : i32
    %c0_i32_0 = arith.constant 0 : i32
    %c0_i32_1 = arith.constant 0 : i32
    return %c0_i32, %c0_i32_0 : i32, i32
  }
  func.func @transform_5(%arg0: i32) -> (i32, i32) {
    %c0_i32 = arith.constant 0 : i32
    %c0_i32_0 = arith.constant 0 : i32
    return %arg0, %c0_i32 : i32, i32
  }
}

</mosaic_0001>

<bundles_post_ra>
// kernel: tile.84
= control target key start
LH: loop header
LB: loop body
LE: loop exit
PB: predicated region body
PF: predicated region fallthrough
CT: control target
= control target key end

     0   :  { %vm5_vm0 = vcmask 1041409   ;;  %vm9_vm1 = vcmask 1042434   ;;  %vm13_vm2 = vcmask 1043459   ;;  %s739_s30 = smov 124   ;;  %s740_s8 = smov 116   ;;  %vm15_vm3 = vcmask 31744   ;;  %s1264_s0 = inlined_call_operand.vmem [shape: f32[4,32,4], index: 0, kind: input, shape index: {}]   ;;  %s1265_s1 = inlined_call_operand.vmem [shape: f32[4,128], index: 1, kind: output, shape index: {}]  }
   0x1   :  { %v584_v0 = vld [vmem:[%s1264_s0 + $0x1f] sm:$0x1]   ;;  %v592_v5 = vld [vmem:[%s1264_s0 + $0x1d] sm:$0x1]   ;;  %v588_v11 = vld [vmem:[%s1264_s0 + $0x1e] sm:$0x1]  }
   0x2   :  { %v585_v1 = vld [vmem:[%s1264_s0 + $0x3e] sm:$0x2]   ;;  %v593_v6 = vld [vmem:[%s1264_s0 + $0x3c] sm:$0x2]   ;;  %v589_v14 = vld [vmem:[%s1264_s0 + $0x3d] sm:$0x2]  }
   0x3   :  { %v586_v2 = vld [vmem:[%s1264_s0 + $0x5d] sm:$0x4]   ;;  %v22_v4 = vsel %vm5_vm0, %v585_v1, %v584_v0  ;;  %v594_v7 = vld [vmem:[%s1264_s0 + $0x5b] sm:$0x4]   ;;  %v58_v9 = vsel %vm5_vm0, %v593_v6, %v592_v5  ;;  %v590_v15 = vld [vmem:[%s1264_s0 + $0x5c] sm:$0x4]   ;;  %v40_v18 = vsel %vm5_vm0, %v589_v14, %v588_v11 }
   0x4   :  { %v587_v3 = vld [vmem:[%s1264_s0 + $0x7c] sm:$0x8]   ;;  %v26_v8 = vsel %vm9_vm1, %v586_v2, %v22_v4  ;;  %v595_v10 = vld [vmem:[%s1264_s0 + $0x7a] sm:$0x8]   ;;  %v62_v13 = vsel %vm9_vm1, %v594_v7, %v58_v9  ;;  %v591_v16 = vld [vmem:[%s1264_s0 + $0x7b] sm:$0x8]   ;;  %v44_v22 = vsel %vm9_vm1, %v590_v15, %v40_v18 }
   0x5   :  { %v30_v12 = vsel %vm13_vm2, %v587_v3, %v26_v8  ;;  %v66_v17 = vsel %vm13_vm2, %v595_v10, %v62_v13  ;;  %v596_v19 = vld [vmem:[%s1264_s0 + $0x1c] sm:$0x1]   ;;  %v600_v25 = vld [vmem:[%s1264_s0 + $0x1b] sm:$0x1]   ;;  %v48_v26 = vsel %vm13_vm2, %v591_v16, %v44_v22  ;;  %v604_v33 = vld [vmem:[%s1264_s0 + $0x1a] sm:$0x1]  }
   0x6   :  { %31 = vrot.lane.b32.xlu0 %v30_v12, %s739_s30  ;;  %v597_v20 = vld [vmem:[%s1264_s0 + $0x3b] sm:$0x2]   ;;  %67 = vrot.lane.b32.xlu1 %v66_v17, %s740_s8  ;;  %v601_v28 = vld [vmem:[%s1264_s0 + $0x3a] sm:$0x2]   ;;  %s741_s25 = smov 120   ;;  %s742_s30 = smov 112  }
   0x7   :  { %v598_v21 = vld [vmem:[%s1264_s0 + $0x5a] sm:$0x4]   ;;  %v76_v23 = vsel %vm5_vm0, %v597_v20, %v596_v19  ;;  %v602_v29 = vld [vmem:[%s1264_s0 + $0x59] sm:$0x4]   ;;  %v94_v32 = vsel %vm5_vm0, %v601_v28, %v600_v25  ;;  %v605_v34 = vld [vmem:[%s1264_s0 + $0x39] sm:$0x2]  }
   0x8   :  { %v599_v24 = vld [vmem:[%s1264_s0 + $0x79] sm:$0x8]   ;;  %v80_v27 = vsel %vm9_vm1, %v598_v21, %v76_v23  ;;  %v603_v30 = vld [vmem:[%s1264_s0 + $0x78] sm:$0x8]   ;;  %v606_v35 = vld [vmem:[%s1264_s0 + $0x58] sm:$0x4]   ;;  %v98_v36 = vsel %vm9_vm1, %v602_v29, %v94_v32  ;;  %v112_v37 = vsel %vm5_vm0, %v605_v34, %v604_v33 }
   0x9   :  { %v84_v31 = vsel %vm13_vm2, %v599_v24, %v80_v27  ;;  %v607_v38 = vld [vmem:[%s1264_s0 + $0x77] sm:$0x8]   ;;  %v608_v39 = vld [vmem:[%s1264_s0 + $0x19] sm:$0x1]   ;;  %v102_v40 = vsel %vm13_vm2, %v603_v30, %v98_v36  ;;  %v116_v41 = vsel %vm9_vm1, %v606_v35, %v112_v37  ;;  %v612_v47 = vld [vmem:[%s1264_s0 + $0x18] sm:$0x1]  }
   0xa   :  { %49 = vrot.lane.b32.xlu0 %v48_v26, %s741_s25  ;;  %85 = vrot.lane.b32.xlu1 %v84_v31, %s742_s30  ;;  %v609_v42 = vld [vmem:[%s1264_s0 + $0x38] sm:$0x2]   ;;  %v120_v45 = vsel %vm13_vm2, %v607_v38, %v116_v41  ;;  %v613_v48 = vld [vmem:[%s1264_s0 + $0x37] sm:$0x2]   ;;  %s743_s18 = smov 108   ;;  %s744_s23 = smov 104  }
   0xb   :  { %v610_v43 = vld [vmem:[%s1264_s0 + $0x57] sm:$0x4]   ;;  %v130_v46 = vsel %vm5_vm0, %v609_v42, %v608_v39  ;;  %v614_v49 = vld [vmem:[%s1264_s0 + $0x56] sm:$0x4]   ;;  %v148_v51 = vsel %vm5_vm0, %v613_v48, %v612_v47  ;;  %v616_v53 = vld [vmem:[%s1264_s0 + $0x17] sm:$0x1]  }
   0xc   :  { %v611_v44 = vld [vmem:[%s1264_s0 + $0x76] sm:$0x8]   ;;  %v134_v50 = vsel %vm9_vm1, %v610_v43, %v130_v46  ;;  %v615_v52 = vld [vmem:[%s1264_s0 + $0x75] sm:$0x8]   ;;  %v152_v54 = vsel %vm9_vm1, %v614_v49, %v148_v51  ;;  %v617_v55 = vld [vmem:[%s1264_s0 + $0x36] sm:$0x2]  }
   0xd   :  { %v618_v56 = vld [vmem:[%s1264_s0 + $0x55] sm:$0x4]   ;;  %v138_v57 = vsel %vm13_vm2, %v611_v44, %v134_v50  ;;  %v166_v58 = vsel %vm5_vm0, %v617_v55, %v616_v53  ;;  %v620_v59 = vld [vmem:[%s1264_s0 + $0x16] sm:$0x1]   ;;  %v156_v62 = vsel %vm13_vm2, %v615_v52, %v152_v54  ;;  %v624_v2 = vld [vmem:[%s1264_s0 + $0x15] sm:$0x1]  }
   0xe   :  { %103 = vrot.lane.b32.xlu0 %v102_v40, %s743_s18  ;;  %121 = vrot.lane.b32.xlu1 %v120_v45, %s744_s23  ;;  %v621_v60 = vld [vmem:[%s1264_s0 + $0x35] sm:$0x2]   ;;  %v170_v63 = vsel %vm9_vm1, %v618_v56, %v166_v58  ;;  %v619_v0 = vld [vmem:[%s1264_s0 + $0x74] sm:$0x8]   ;;  %s745_s11 = smov 100   ;;  %s746_s18 = smov 96  }
   0xf   :  { %v622_v61 = vld [vmem:[%s1264_s0 + $0x54] sm:$0x4]   ;;  %v184_v1 = vsel %vm5_vm0, %v621_v60, %v620_v59  ;;  %v625_v5 = vld [vmem:[%s1264_s0 + $0x34] sm:$0x2]   ;;  %v628_v8 = vld [vmem:[%s1264_s0 + $0x14] sm:$0x1]   ;;  %v174_v11 = vsel %vm13_vm2, %v619_v0, %v170_v63 }
  0x10   :  { %v188_v3 = vsel %vm9_vm1, %v622_v61, %v184_v1  ;;  %v623_v4 = vld [vmem:[%s1264_s0 + $0x73] sm:$0x8]   ;;  %v626_v6 = vld [vmem:[%s1264_s0 + $0x53] sm:$0x4]   ;;  %v202_v7 = vsel %vm5_vm0, %v625_v5, %v624_v2  ;;  %v629_v9 = vld [vmem:[%s1264_s0 + $0x33] sm:$0x2]  }
  0x11   :  { %v630_v10 = vld [vmem:[%s1264_s0 + $0x52] sm:$0x4]   ;;  %v220_v12 = vsel %vm5_vm0, %v629_v9, %v628_v8  ;;  %v632_v13 = vld [vmem:[%s1264_s0 + $0x13] sm:$0x1]   ;;  %v192_v14 = vsel %vm13_vm2, %v623_v4, %v188_v3  ;;  %v206_v15 = vsel %vm9_vm1, %v626_v6, %v202_v7  ;;  %v627_v16 = vld [vmem:[%s1264_s0 + $0x72] sm:$0x8]  }
  0x12   :  { %139 = vrot.lane.b32.xlu0 %v138_v57, %s745_s11  ;;  %157 = vrot.lane.b32.xlu1 %v156_v62, %s746_s18  ;;  %v631_v17 = vld [vmem:[%s1264_s0 + $0x71] sm:$0x8]   ;;  %v633_v18 = vld [vmem:[%s1264_s0 + $0x32] sm:$0x2]   ;;  %v224_v19 = vsel %vm9_vm1, %v630_v10, %v220_v12  ;;  %s747_s4 = smov 92   ;;  %s748_s9 = smov 88   ;;  %v210_v27 = vsel %vm13_vm2, %v627_v16, %v206_v15 }
  0x13   :  { %v238_v20 = vsel %vm5_vm0, %v633_v18, %v632_v13  ;;  %v634_v21 = vld [vmem:[%s1264_s0 + $0x51] sm:$0x4]   ;;  %v636_v22 = vld [vmem:[%s1264_s0 + $0x12] sm:$0x1]   ;;  %v640_v26 = vld [vmem:[%s1264_s0 + $0x11] sm:$0x1]   ;;  %v228_v29 = vsel %vm13_vm2, %v631_v17, %v224_v19 }
  0x14   :  { %v637_v23 = vld [vmem:[%s1264_s0 + $0x31] sm:$0x2]   ;;  %v641_v28 = vld [vmem:[%s1264_s0 + $0x30] sm:$0x2]   ;;  %v242_v30 = vsel %vm9_vm1, %v634_v21, %v238_v20  ;;  %v635_v31 = vld [vmem:[%s1264_s0 + $0x70] sm:$0x8]  }
  0x15   :  { %v256_v24 = vsel %vm5_vm0, %v637_v23, %v636_v22  ;;  %v638_v25 = vld [vmem:[%s1264_s0 + $0x50] sm:$0x4]   ;;  %v644_v32 = vld [vmem:[%s1264_s0 + $0x10] sm:$0x1]   ;;  %v274_v36 = vsel %vm5_vm0, %v641_v28, %v640_v26  ;;  %v642_v37 = vld [vmem:[%s1264_s0 + $0x4f] sm:$0x4]   ;;  %v246_v42 = vsel %vm13_vm2, %v635_v31, %v242_v30 }
  0x16   :  { %175 = vrot.lane.b32.xlu0 %v174_v11, %s747_s4  ;;  %193 = vrot.lane.b32.xlu1 %v192_v14, %s748_s9  ;;  %v645_v33 = vld [vmem:[%s1264_s0 + $0x2f] sm:$0x2]   ;;  %v260_v34 = vsel %vm9_vm1, %v638_v25, %v256_v24  ;;  %v639_v35 = vld [vmem:[%s1264_s0 + $0x6f] sm:$0x8]   ;;  %s749_s22 = smov 84   ;;  %s750_s29 = smov 80   ;;  %v278_v46 = vsel %vm9_vm1, %v642_v37, %v274_v36 }
  0x17   :  { %v292_v38 = vsel %vm5_vm0, %v645_v33, %v644_v32  ;;  %v646_v39 = vld [vmem:[%s1264_s0 + $0x4e] sm:$0x4]   ;;  %v648_v40 = vld [vmem:[%s1264_s0 + $0xf] sm:$0x1]   ;;  %v652_v43 = vld [vmem:[%s1264_s0 + $0xe] sm:$0x1]   ;;  %v264_v45 = vsel %vm13_vm2, %v639_v35, %v260_v34 }
  0x18   :  { %v649_v41 = vld [vmem:[%s1264_s0 + $0x2e] sm:$0x2]   ;;  %v653_v44 = vld [vmem:[%s1264_s0 + $0x2d] sm:$0x2]   ;;  %v643_v47 = vld [vmem:[%s1264_s0 + $0x6e] sm:$0x8]   ;;  %v296_v48 = vsel %vm9_vm1, %v646_v39, %v292_v38 }
  0x19   :  { %v647_v49 = vld [vmem:[%s1264_s0 + $0x6d] sm:$0x8]   ;;  %v310_v50 = vsel %vm5_vm0, %v649_v41, %v648_v40  ;;  %v650_v51 = vld [vmem:[%s1264_s0 + $0x4d] sm:$0x4]   ;;  %s751_s11 = smov 76   ;;  %v328_v52 = vsel %vm5_vm0, %v653_v44, %v652_v43  ;;  %s752_s18 = smov 72   ;;  %v282_v56 = vsel %vm13_vm2, %v643_v47, %v278_v46 }
  0x1a   :  { %211 = vrot.lane.b32.xlu0 %v210_v27, %s749_s22  ;;  %229 = vrot.lane.b32.xlu1 %v228_v29, %s750_s29  ;;  %v654_v53 = vld [vmem:[%s1264_s0 + $0x4c] sm:$0x4]   ;;  %v656_v54 = vld [vmem:[%s1264_s0 + $0xd] sm:$0x1]   ;;  %v300_v59 = vsel %vm13_vm2, %v647_v49, %v296_v48  ;;  %v314_v60 = vsel %vm9_vm1, %v650_v51, %v310_v50  ;;  %s753_s29 = smov 68   ;;  %s754_s7 = smov 64  }
  0x1b   :  { %v657_v55 = vld [vmem:[%s1264_s0 + $0x2c] sm:$0x2]   ;;  %v660_v57 = vld [vmem:[%s1264_s0 + $0xc] sm:$0x1]   ;;  %v651_v61 = vld [vmem:[%s1264_s0 + $0x6c] sm:$0x8]   ;;  %v332_v62 = vsel %vm9_vm1, %v654_v53, %v328_v52 }
  0x1c   :  { %v661_v58 = vld [vmem:[%s1264_s0 + $0x2b] sm:$0x2]   ;;  %v655_v63 = vld [vmem:[%s1264_s0 + $0x6b] sm:$0x8]   ;;  %v346_v0 = vsel %vm5_vm0, %v657_v55, %v656_v54  ;;  %v658_v1 = vld [vmem:[%s1264_s0 + $0x4b] sm:$0x4]   ;;  %v318_v6 = vsel %vm13_vm2, %v651_v61, %v314_v60 }
  0x1d   :  { %v364_v2 = vsel %vm5_vm0, %v661_v58, %v660_v57  ;;  %v662_v3 = vld [vmem:[%s1264_s0 + $0x4a] sm:$0x4]   ;;  %v664_v4 = vld [vmem:[%s1264_s0 + $0xb] sm:$0x1]   ;;  %v668_v7 = vld [vmem:[%s1264_s0 + $0xa] sm:$0x1]   ;;  %v336_v9 = vsel %vm13_vm2, %v655_v63, %v332_v62  ;;  %v350_v10 = vsel %vm9_vm1, %v658_v1, %v346_v0 }
  0x1e   :  { %247 = vrot.lane.b32.xlu0 %v246_v42, %s751_s11  ;;  %265 = vrot.lane.b32.xlu1 %v264_v45, %s752_s18  ;;  %v665_v5 = vld [vmem:[%s1264_s0 + $0x2a] sm:$0x2]   ;;  %v669_v8 = vld [vmem:[%s1264_s0 + $0x29] sm:$0x2]   ;;  %v368_v12 = vsel %vm9_vm1, %v662_v3, %v364_v2  ;;  %s755_s18 = smov 60   ;;  %s756_s25 = smov 56  }
  0x1f   :  { %v659_v11 = vld [vmem:[%s1264_s0 + $0x6a] sm:$0x8]   ;;  %v663_v13 = vld [vmem:[%s1264_s0 + $0x69] sm:$0x8]   ;;  %v382_v14 = vsel %vm5_vm0, %v665_v5, %v664_v4  ;;  %v666_v15 = vld [vmem:[%s1264_s0 + $0x49] sm:$0x4]   ;;  %v400_v16 = vsel %vm5_vm0, %v669_v8, %v668_v7 }
  0x20   :  { %v670_v17 = vld [vmem:[%s1264_s0 + $0x48] sm:$0x4]   ;;  %v672_v18 = vld [vmem:[%s1264_s0 + $0x9] sm:$0x1]   ;;  %v354_v20 = vsel %vm13_vm2, %v659_v11, %v350_v10  ;;  %v676_v21 = vld [vmem:[%s1264_s0 + $0x8] sm:$0x1]   ;;  %v372_v23 = vsel %vm13_vm2, %v663_v13, %v368_v12  ;;  %v386_v24 = vsel %vm9_vm1, %v666_v15, %v382_v14 }
  0x21   :  { %v673_v19 = vld [vmem:[%s1264_s0 + $0x28] sm:$0x2]   ;;  %v677_v22 = vld [vmem:[%s1264_s0 + $0x27] sm:$0x2]   ;;  %v667_v25 = vld [vmem:[%s1264_s0 + $0x68] sm:$0x8]   ;;  %v404_v26 = vsel %vm9_vm1, %v670_v17, %v400_v16 }
  0x22   :  { %283 = vrot.lane.b32.xlu0 %v282_v56, %s753_s29  ;;  %301 = vrot.lane.b32.xlu1 %v300_v59, %s754_s7  ;;  %v671_v27 = vld [vmem:[%s1264_s0 + $0x67] sm:$0x8]   ;;  %v418_v28 = vsel %vm5_vm0, %v673_v19, %v672_v18  ;;  %v674_v29 = vld [vmem:[%s1264_s0 + $0x47] sm:$0x4]   ;;  %s757_s7 = smov 52   ;;  %v436_v30 = vsel %vm5_vm0, %v677_v22, %v676_v21  ;;  %s758_s14 = smov 48   ;;  %v390_v34 = vsel %vm13_vm2, %v667_v25, %v386_v24 }
  0x23   :  { %v678_v31 = vld [vmem:[%s1264_s0 + $0x46] sm:$0x4]   ;;  %v680_v32 = vld [vmem:[%s1264_s0 + $0x7] sm:$0x1]   ;;  %v684_v35 = vld [vmem:[%s1264_s0 + $0x6] sm:$0x1]   ;;  %v408_v37 = vsel %vm13_vm2, %v671_v27, %v404_v26  ;;  %v422_v38 = vsel %vm9_vm1, %v674_v29, %v418_v28 }
  0x24   :  { %v681_v33 = vld [vmem:[%s1264_s0 + $0x26] sm:$0x2]   ;;  %v685_v36 = vld [vmem:[%s1264_s0 + $0x25] sm:$0x2]   ;;  %v675_v39 = vld [vmem:[%s1264_s0 + $0x66] sm:$0x8]   ;;  %v440_v40 = vsel %vm9_vm1, %v678_v31, %v436_v30 }
  0x25   :  { %v679_v41 = vld [vmem:[%s1264_s0 + $0x65] sm:$0x8]   ;;  %v454_v42 = vsel %vm5_vm0, %v681_v33, %v680_v32  ;;  %v682_v43 = vld [vmem:[%s1264_s0 + $0x45] sm:$0x4]   ;;  %v472_v45 = vsel %vm5_vm0, %v685_v36, %v684_v35  ;;  %v686_v46 = vld [vmem:[%s1264_s0 + $0x44] sm:$0x4]   ;;  %v426_v49 = vsel %vm13_vm2, %v675_v39, %v422_v38 }
  0x26   :  { %319 = vrot.lane.b32.xlu0 %v318_v6, %s755_s18  ;;  %337 = vrot.lane.b32.xlu1 %v336_v9, %s756_s25  ;;  %s759_s25 = smov 44   ;;  %v683_v44 = vld [vmem:[%s1264_s0 + $0x64] sm:$0x8]   ;;  %v688_v47 = vld [vmem:[%s1264_s0 + $0x5] sm:$0x1]   ;;  %s760_s5 = smov 40   ;;  %v444_v53 = vsel %vm13_vm2, %v679_v41, %v440_v40  ;;  %v458_v54 = vsel %vm9_vm1, %v682_v43, %v454_v42  ;;  %v476_v58 = vsel %vm9_vm1, %v686_v46, %v472_v45 }
  0x27   :  { %v689_v48 = vld [vmem:[%s1264_s0 + $0x24] sm:$0x2]   ;;  %v687_v50 = vld [vmem:[%s1264_s0 + $0x63] sm:$0x8]   ;;  %v692_v51 = vld [vmem:[%s1264_s0 + $0x4] sm:$0x1]   ;;  %v462_v3 = vsel %vm13_vm2, %v683_v44, %v458_v54 }
  0x28   :  { %v693_v52 = vld [vmem:[%s1264_s0 + $0x23] sm:$0x2]   ;;  %v690_v55 = vld [vmem:[%s1264_s0 + $0x43] sm:$0x4]   ;;  %v582_v57 = vld [vmem:[%s1264_s0 + $0x3e] sm:$0x4]   ;;  %v490_v59 = vsel %vm5_vm0, %v689_v48, %v688_v47  ;;  %v480_v7 = vsel %vm13_vm2, %v687_v50, %v476_v58 }
  0x29   :  { %v694_v56 = vld [vmem:[%s1264_s0 + $0x42] sm:$0x4]   ;;  %v583_v60 = vld [vmem:[%s1264_s0 + $0x5d] sm:$0x8]   ;;  %s761_s24 = smov 36   ;;  %v508_v63 = vsel %vm5_vm0, %v693_v52, %v692_v51  ;;  %s762_s29 = smov 32   ;;  %v494_v8 = vsel %vm9_vm1, %v690_v55, %v490_v59 }
  0x2a   :  { %355 = vrot.lane.b32.xlu0 %v354_v20, %s757_s7  ;;  %373 = vrot.lane.b32.xlu1 %v372_v23, %s758_s14  ;;  %v2_v61 = vld [vmem:[%s1264_s0] sm:$0x1]   ;;  %v696_v0 = vld [vmem:[%s1264_s0 + $0x3] sm:$0x1]   ;;  %v512_v11 = vsel %vm9_vm1, %v694_v56, %v508_v63  ;;  %s763_s11 = smov 28   ;;  %s764_s18 = smov 24  }
  0x2b   :  { %v581_v62 = vld [vmem:[%s1264_s0 + $0x1f] sm:$0x2]   ;;  %v697_v1 = vld [vmem:[%s1264_s0 + $0x22] sm:$0x2]   ;;  %v700_v4 = vld [vmem:[%s1264_s0 + $0x2] sm:$0x1]  }
  0x2c   :  { %v6_v2 = vsel %vm5_vm0, %v581_v62, %v2_v61  ;;  %v701_v5 = vld [vmem:[%s1264_s0 + $0x21] sm:$0x2]   ;;  %v691_v9 = vld [vmem:[%s1264_s0 + $0x62] sm:$0x8]   ;;  %v695_v12 = vld [vmem:[%s1264_s0 + $0x61] sm:$0x8]   ;;  %v526_v13 = vsel %vm5_vm0, %v697_v1, %v696_v0 }
  0x2d   :  { %v10_v6 = vsel %vm9_vm1, %v582_v57, %v6_v2  ;;  %v698_v14 = vld [vmem:[%s1264_s0 + $0x41] sm:$0x4]   ;;  %v544_v15 = vsel %vm5_vm0, %v701_v5, %v700_v4  ;;  %v702_v16 = vld [vmem:[%s1264_s0 + $0x40] sm:$0x4]   ;;  %v704_v17 = vld [vmem:[%s1264_s0 + $0x1] sm:$0x1]   ;;  %v498_v19 = vsel %vm13_vm2, %v691_v9, %v494_v8  ;;  %v516_v20 = vsel %vm13_vm2, %v695_v12, %v512_v11 }
  0x2e   :  { %391 = vrot.lane.b32.xlu0 %v390_v34, %s759_s25  ;;  %409 = vrot.lane.b32.xlu1 %v408_v37, %s760_s5  ;;  %v14_v10 = vsel %vm13_vm2, %v583_v60, %v10_v6  ;;  %v705_v18 = vld [vmem:[%s1264_s0 + $0x20] sm:$0x2]   ;;  %v530_v21 = vsel %vm9_vm1, %v698_v14, %v526_v13  ;;  %v699_v22 = vld [vmem:[%s1264_s0 + $0x60] sm:$0x8]   ;;  %v548_v23 = vsel %vm9_vm1, %v702_v16, %v544_v15  ;;  %s765_s25 = smov 20   ;;  %s766_s26 = smov 16  }
  0x2f   :  { %16 = vst.msk [vmem:[#allocation0] sm:$0xf] %vm15_vm3, %v14_v10   ;;  %v703_v24 = vld [vmem:[%s1264_s0 + $0x5f] sm:$0x8]   ;;  %v562_v25 = vsel %vm5_vm0, %v705_v18, %v704_v17  ;;  %v706_v26 = vld [vmem:[%s1264_s0 + $0x3f] sm:$0x4]   ;;  %v534_v27 = vsel %vm13_vm2, %v699_v22, %v530_v21 }
  0x30   :  { %v552_v28 = vsel %vm13_vm2, %v703_v24, %v548_v23  ;;  %v566_v29 = vsel %vm9_vm1, %v706_v26, %v562_v25  ;;  %v707_v30 = vld [vmem:[%s1264_s0 + $0x5e] sm:$0x8]   ;;  %s767_s0 = smov 12   ;;  %s769_s30 = smov 4   ;;  %vm33_vm4 = vcmask 1048544   ;;  %vm51_vm5 = vcmask 1015744  }
  0x31   :  { %v570_v31 = vsel %vm13_vm2, %v707_v30, %v566_v29  ;;  %vm69_vm6 = vcmask 982944   ;;  %vm87_vm7 = vcmask 950144   ;;  %vm105_vm8 = vcmask 917344  }
  0x32   :  { %427 = vrot.lane.b32.xlu0 %v426_v49, %s761_s24  ;;  %445 = vrot.lane.b32.xlu1 %v444_v53, %s762_s29  ;;  %s768_s29 = smov 8   ;;  %vm123_vm9 = vcmask 884544   ;;  %vm141_vm10 = vcmask 851744   ;;  %vm159_vm11 = vcmask 818944   ;;  %vm177_vm12 = vcmask 786144  }
  0x33   :  { %vm195_vm13 = vcmask 753344   ;;  %vm213_vm14 = vcmask 720544   ;;  %vm231_vm15 = vcmask 687744   ;;  %vm249_vm0 = vcmask 654944  }
  0x34   :  { %vm267_vm1 = vcmask 622144   ;;  %vm285_vm2 = vcmask 589344   ;;  %vm303_vm3 = vcmask 556544  }
  0x36   :  { %463 = vrot.lane.b32.xlu0 %v462_v3, %s763_s11  ;;  %481 = vrot.lane.b32.xlu1 %v480_v7, %s764_s18 }
  0x3a   :  { %499 = vrot.lane.b32.xlu0 %v498_v19, %s765_s25  ;;  %517 = vrot.lane.b32.xlu1 %v516_v20, %s766_s26 }
  0x3e   :  { %535 = vrot.lane.b32.xlu0 %v534_v27, %s767_s0  ;;  %553 = vrot.lane.b32.xlu1 %v552_v28, %s768_s29 }
  0x42   :  { %571 = vrot.lane.b32.xlu0 %v570_v31, %s769_s30 }
  0x78   :  { %v32_v32 = vpop.permute.xlu0 %31   ;;  %v68_v33 = vpop.permute.xlu1 %67  }
  0x79   :  { %34 = vst.msk [vmem:[#allocation0] sm:$0xf] %vm33_vm4, %v32_v32   ;;  %vm321_vm4 = vcmask 523744  }
  0x7c   :  { %v50_v34 = vpop.permute.xlu0 %49   ;;  %v86_v35 = vpop.permute.xlu1 %85  }
  0x7d   :  { %52 = vst.msk [vmem:[#allocation0] sm:$0xf] %vm51_vm5, %v50_v34   ;;  %vm339_vm5 = vcmask 490944  }
  0x7e   :  { %70 = vst.msk [vmem:[#allocation0] sm:$0xf] %vm69_vm6, %v68_v33   ;;  %vm357_vm6 = vcmask 458144  }
  0x7f   :  { %88 = vst.msk [vmem:[#allocation0] sm:$0xf] %vm87_vm7, %v86_v35   ;;  %vm375_vm7 = vcmask 425344  }
  0x80   :  { %v104_v36 = vpop.permute.xlu0 %103   ;;  %v122_v37 = vpop.permute.xlu1 %121  }
  0x81   :  { %106 = vst.msk [vmem:[#allocation0] sm:$0xf] %vm105_vm8, %v104_v36   ;;  %vm393_vm8 = vcmask 392544  }
  0x82   :  { %124 = vst.msk [vmem:[#allocation0] sm:$0xf] %vm123_vm9, %v122_v37   ;;  %vm411_vm9 = vcmask 359744  }
  0x84   :  { %v140_v38 = vpop.permute.xlu0 %139   ;;  %v158_v39 = vpop.permute.xlu1 %157  }
  0x85   :  { %142 = vst.msk [vmem:[#allocation0] sm:$0xf] %vm141_vm10, %v140_v38   ;;  %vm429_vm10 = vcmask 326944  }
  0x86   :  { %160 = vst.msk [vmem:[#allocation0] sm:$0xf] %vm159_vm11, %v158_v39   ;;  %vm447_vm11 = vcmask 294144  }
  0x88   :  { %v176_v40 = vpop.permute.xlu0 %175   ;;  %v194_v41 = vpop.permute.xlu1 %193  }
  0x89   :  { %178 = vst.msk [vmem:[#allocation0] sm:$0xf] %vm177_vm12, %v176_v40   ;;  %vm465_vm12 = vcmask 261344  }
  0x8a   :  { %196 = vst.msk [vmem:[#allocation0] sm:$0xf] %vm195_vm13, %v194_v41   ;;  %vm483_vm13 = vcmask 228544  }
  0x8c   :  { %v212_v42 = vpop.permute.xlu0 %211   ;;  %v230_v43 = vpop.permute.xlu1 %229  }
  0x8d   :  { %214 = vst.msk [vmem:[#allocation0] sm:$0xf] %vm213_vm14, %v212_v42   ;;  %vm501_vm14 = vcmask 195744  }
  0x8e   :  { %232 = vst.msk [vmem:[#allocation0] sm:$0xf] %vm231_vm15, %v230_v43   ;;  %vm519_vm15 = vcmask 162944  }
  0x90   :  { %v248_v44 = vpop.permute.xlu0 %247   ;;  %v266_v45 = vpop.permute.xlu1 %265  }
  0x91   :  { %250 = vst.msk [vmem:[#allocation0] sm:$0xf] %vm249_vm0, %v248_v44   ;;  %vm537_vm0 = vcmask 130144  }
  0x92   :  { %268 = vst.msk [vmem:[#allocation0] sm:$0xf] %vm267_vm1, %v266_v45   ;;  %vm555_vm1 = vcmask 97344  }
  0x94   :  { %v284_v46 = vpop.permute.xlu0 %283   ;;  %v302_v47 = vpop.permute.xlu1 %301  }
  0x95   :  { %286 = vst.msk [vmem:[#allocation0] sm:$0xf] %vm285_vm2, %v284_v46   ;;  %vm573_vm2 = vcmask 64544  }
  0x96   :  { %304 = vst.msk [vmem:[#allocation0] sm:$0xf] %vm303_vm3, %v302_v47  }
  0x98   :  { %v320_v48 = vpop.permute.xlu0 %319   ;;  %v338_v49 = vpop.permute.xlu1 %337  }
  0x99   :  { %322 = vst.msk [vmem:[#allocation0] sm:$0xf] %vm321_vm4, %v320_v48  }
  0x9a   :  { %340 = vst.msk [vmem:[#allocation0] sm:$0xf] %vm339_vm5, %v338_v49  }
  0x9c   :  { %v356_v50 = vpop.permute.xlu0 %355   ;;  %v374_v51 = vpop.permute.xlu1 %373  }
  0x9d   :  { %358 = vst.msk [vmem:[#allocation0] sm:$0xf] %vm357_vm6, %v356_v50  }
  0x9e   :  { %376 = vst.msk [vmem:[#allocation0] sm:$0xf] %vm375_vm7, %v374_v51  }
  0xa0   :  { %v392_v52 = vpop.permute.xlu0 %391   ;;  %v410_v53 = vpop.permute.xlu1 %409  }
  0xa1   :  { %394 = vst.msk [vmem:[#allocation0] sm:$0xf] %vm393_vm8, %v392_v52  }
  0xa2   :  { %412 = vst.msk [vmem:[#allocation0] sm:$0xf] %vm411_vm9, %v410_v53  }
  0xa4   :  { %v428_v54 = vpop.permute.xlu0 %427   ;;  %v446_v55 = vpop.permute.xlu1 %445  }
  0xa5   :  { %430 = vst.msk [vmem:[#allocation0] sm:$0xf] %vm429_vm10, %v428_v54  }
  0xa6   :  { %448 = vst.msk [vmem:[#allocation0] sm:$0xf] %vm447_vm11, %v446_v55  }
  0xa8   :  { %v464_v56 = vpop.permute.xlu0 %463   ;;  %v482_v57 = vpop.permute.xlu1 %481  }
  0xa9   :  { %466 = vst.msk [vmem:[#allocation0] sm:$0xf] %vm465_vm12, %v464_v56  }
  0xaa   :  { %484 = vst.msk [vmem:[#allocation0] sm:$0xf] %vm483_vm13, %v482_v57  }
  0xac   :  { %v500_v58 = vpop.permute.xlu0 %499   ;;  %v518_v59 = vpop.permute.xlu1 %517  }
  0xad   :  { %502 = vst.msk [vmem:[#allocation0] sm:$0xf] %vm501_vm14, %v500_v58  }
  0xae   :  { %520 = vst.msk [vmem:[#allocation0] sm:$0xf] %vm519_vm15, %v518_v59  }
  0xb0   :  { %v536_v60 = vpop.permute.xlu0 %535   ;;  %v554_v61 = vpop.permute.xlu1 %553  }
  0xb1   :  { %538 = vst.msk [vmem:[#allocation0] sm:$0xf] %vm537_vm0, %v536_v60  }
  0xb2   :  { %556 = vst.msk [vmem:[#allocation0] sm:$0xf] %vm555_vm1, %v554_v61  }
  0xb4   :  { %v572_v62 = vpop.permute.xlu0 %571  }
  0xb5   :  { %574 = vst.msk [vmem:[#allocation0] sm:$0xf] %vm573_vm2, %v572_v62  }
  0xbc   :  { %v578_v63 = vld [vmem:[#allocation0] sm:$0xf] }
  0xbd   :  { %580 = vst [vmem:[%s1265_s1] sm:$0xf] %v578_v63 }

// kernel: tile.89
= control target key start
LH: loop header
LB: loop body
LE: loop exit
PB: predicated region body
PF: predicated region fallthrough
CT: control target
= control target key end

     0   :  { %s67_s8 = smov 28   ;;  %s68_s11 = smov 20   ;;  %vm3_vm0 = vcmask 31744   ;;  %vm9_vm1 = vcmask 261344   ;;  %vm15_vm2 = vcmask 228544   ;;  %vm21_vm3 = vcmask 195744   ;;  %s111_s0 = inlined_call_operand.vmem [shape: f32[4,8,4], index: 0, kind: input, shape index: {}]   ;;  %s112_s1 = inlined_call_operand.vmem [shape: f32[4,32], index: 1, kind: output, shape index: {}]  }
   0x1   :  { %v53_v0 = vld [vmem:[%s111_s0 + $0x7] ss:$8 sm:$0xf]   ;;  %v55_v1 = vld [vmem:[%s111_s0 + $0x5] ss:$8 sm:$0xf]  }
   0x2   :  { %7 = vrot.lane.b32.xlu0 %v53_v0, %s67_s8  ;;  %19 = vrot.lane.b32.xlu1 %v55_v1, %s68_s11  ;;  %v54_v2 = vld [vmem:[%s111_s0 + $0x6] ss:$8 sm:$0xf]   ;;  %v56_v3 = vld [vmem:[%s111_s0 + $0x4] ss:$8 sm:$0xf]  }
   0x3   :  { %s69_s16 = smov 24   ;;  %v2_v4 = vld [vmem:[%s111_s0] ss:$8 sm:$0xf]   ;;  %s70_s19 = smov 16   ;;  %vm27_vm4 = vcmask 162944  }
   0x4   :  { %v57_v5 = vld [vmem:[%s111_s0 + $0x3] ss:$8 sm:$0xf]   ;;  %4 = vst.msk [vmem:[#allocation0] sm:$0xf] %vm3_vm0, %v2_v4   ;;  %s71_s24 = smov 12  }
   0x5   :  { %v58_v6 = vld [vmem:[%s111_s0 + $0x2] ss:$8 sm:$0xf]   ;;  %s72_s25 = smov 8   ;;  %vm33_vm5 = vcmask 130144   ;;  %vm39_vm6 = vcmask 97344  }
   0x6   :  { %13 = vrot.lane.b32.xlu0 %v54_v2, %s69_s16  ;;  %25 = vrot.lane.b32.xlu1 %v56_v3, %s70_s19  ;;  %v59_v7 = vld [vmem:[%s111_s0 + $0x1] ss:$8 sm:$0xf]   ;;  %s73_s0 = smov 4   ;;  %vm45_vm7 = vcmask 64544  }
   0xa   :  { %31 = vrot.lane.b32.xlu0 %v57_v5, %s71_s24  ;;  %37 = vrot.lane.b32.xlu1 %v58_v6, %s72_s25 }
   0xe   :  { %43 = vrot.lane.b32.xlu0 %v59_v7, %s73_s0 }
  0x74   :  { %v8_v8 = vpop.permute.xlu0 %7   ;;  %v20_v9 = vpop.permute.xlu1 %19  }
  0x75   :  { %10 = vst.msk [vmem:[#allocation0] sm:$0xf] %vm9_vm1, %v8_v8  }
  0x78   :  { %v14_v10 = vpop.permute.xlu0 %13   ;;  %v26_v11 = vpop.permute.xlu1 %25  }
  0x79   :  { %16 = vst.msk [vmem:[#allocation0] sm:$0xf] %vm15_vm2, %v14_v10  }
  0x7a   :  { %22 = vst.msk [vmem:[#allocation0] sm:$0xf] %vm21_vm3, %v20_v9  }
  0x7b   :  { %28 = vst.msk [vmem:[#allocation0] sm:$0xf] %vm27_vm4, %v26_v11  }
  0x7c   :  { %v32_v12 = vpop.permute.xlu0 %31   ;;  %v38_v13 = vpop.permute.xlu1 %37  }
  0x7d   :  { %34 = vst.msk [vmem:[#allocation0] sm:$0xf] %vm33_vm5, %v32_v12  }
  0x7e   :  { %40 = vst.msk [vmem:[#allocation0] sm:$0xf] %vm39_vm6, %v38_v13  }
  0x80   :  { %v44_v14 = vpop.permute.xlu0 %43  }
  0x81   :  { %46 = vst.msk [vmem:[#allocation0] sm:$0xf] %vm45_vm7, %v44_v14  }
  0x88   :  { %v50_v15 = vld [vmem:[#allocation0] sm:$0xf] }
  0x89   :  { %52 = vst [vmem:[%s112_s1] sm:$0xf] %v50_v15 }

// kernel: tile.68
= control target key start
LH: loop header
LB: loop body
LE: loop exit
PB: predicated region body
PF: predicated region fallthrough
CT: control target
= control target key end

     0   :  { %s22_s0 = inlined_call_operand.vmem [shape: f32[64], index: 0, kind: input, shape index: {}]   ;;  %s23_s1 = inlined_call_operand.vmem [shape: f32[4,64], index: 1, kind: output, shape index: {}]  }
   0x1   :  { %v4_v0 = vld [vmem:[%s22_s0] ss:$0 sm:$0xff] }
   0x2   :  { %5 = vst [vmem:[%s23_s1] sm:$0xf] %v4_v0 }

// kernel: tile.69
= control target key start
LH: loop header
LB: loop body
LE: loop exit
PB: predicated region body
PF: predicated region fallthrough
CT: control target
= control target key end

     0   :  { %s6_s8 = smov 3  ;;  %vm8_vm0 = vcmask 523264   ;;  %s24_s9 = smov 64   ;;  %vm15_vm1 = vcmask 1048064   ;;  %s41_s0 = inlined_call_operand.vmem [shape: f32[4,64], index: 0, kind: input, shape index: {}]   ;;  %s42_s1 = inlined_call_operand.vmem [shape: f32[256], index: 1, kind: output, shape index: {}]  }
   0x1   :  { %v4_v0 = vld [vmem:[%s41_s0] sm:$0xf]  ;;  %s11_s0 = smov 3 }
   0x2   :  { %5 = vst [vmem:[#allocation1] sm:$0xf] %v4_v0 }
   0x9   :  { %v12_v1 = vld [vmem:[#allocation1 + $0x1] ss:$2 sm:%s11_s0]   ;;  %v7_v2 = vld [vmem:[#allocation1] ss:$2 sm:%s6_s8]  }
   0xa   :  { %13 = vrot.lane.b32.xlu0 %v12_v1, %s24_s9  ;;  %9 = vst.msk [vmem:[#allocation0] sm:$0x3] %vm8_vm0, %v7_v2  }
  0x7c   :  { %v14_v3 = vpop.permute.xlu0 %13  }
  0x7d   :  { %16 = vst.msk [vmem:[#allocation0] sm:$0x3] %vm15_vm1, %v14_v3  }
  0x84   :  { %v20_v4 = vld [vmem:[#allocation0] sm:$0x3] }
  0x85   :  { %22 = vst [vmem:[%s42_s1] sm:$0x3] %v20_v4 }

// kernel: tile.93
= control target key start
LH: loop header
LB: loop body
LE: loop exit
PB: predicated region body
PF: predicated region fallthrough
CT: control target
= control target key end

     0   :  { %s40_s0 = inlined_call_operand.vmem [shape: f32[4], index: 0, kind: input, shape index: {}]   ;;  %s41_s1 = inlined_call_operand.vmem [shape: f32[32,4], index: 1, kind: output, shape index: {}]  }
   0x1   :  { %v4_v0 = vld [vmem:[%s40_s0] ss:$0 sm:$0xff] }
   0x2   :  { %5 = vst [vmem:[%s41_s1] sm:$0xff] %v4_v0  ;;  %12 = vst [vmem:[%s41_s1 + $0x8] sm:$0xff] %v4_v0 }
   0x3   :  { %13 = vst [vmem:[%s41_s1 + $0x10] sm:$0xff] %v4_v0  ;;  %14 = vst [vmem:[%s41_s1 + $0x18] sm:$0xff] %v4_v0 }

// kernel: tile.94
= control target key start
LH: loop header
LB: loop body
LE: loop exit
PB: predicated region body
PF: predicated region fallthrough
CT: control target
= control target key end

     0   :  { %s259_s10 = smov 124   ;;  %s260_s11 = smov 116   ;;  %vm3_vm0 = vcmask 31744   ;;  %vm9_vm1 = vcmask 1048544   ;;  %vm15_vm2 = vcmask 1015744   ;;  %vm21_vm3 = vcmask 982944   ;;  %s399_s0 = inlined_call_operand.vmem [shape: f32[32,4], index: 0, kind: input, shape index: {}]   ;;  %s400_s1 = inlined_call_operand.vmem [shape: f32[128], index: 1, kind: output, shape index: {}]  }
   0x1   :  { %v197_v0 = vld [vmem:[%s399_s0 + $0x1f] sm:$0x1]   ;;  %v199_v1 = vld [vmem:[%s399_s0 + $0x1d] sm:$0x1]   ;;  %v198_v2 = vld [vmem:[%s399_s0 + $0x1e] sm:$0x1]  }
   0x2   :  { %7 = vrot.lane.b32.xlu0 %v197_v0, %s259_s10  ;;  %19 = vrot.lane.b32.xlu1 %v199_v1, %s260_s11  ;;  %v200_v3 = vld [vmem:[%s399_s0 + $0x1c] sm:$0x1]   ;;  %s261_s16 = smov 120   ;;  %s262_s17 = smov 112   ;;  %v201_v4 = vld [vmem:[%s399_s0 + $0x1b] sm:$0x1]  }
   0x3   :  { %v202_v5 = vld [vmem:[%s399_s0 + $0x1a] sm:$0x1]   ;;  %s263_s22 = smov 108   ;;  %s264_s23 = smov 104   ;;  %v203_v6 = vld [vmem:[%s399_s0 + $0x19] sm:$0x1]  }
   0x4   :  { %v204_v7 = vld [vmem:[%s399_s0 + $0x18] sm:$0x1]   ;;  %s265_s28 = smov 100   ;;  %s266_s29 = smov 96   ;;  %v205_v8 = vld [vmem:[%s399_s0 + $0x17] sm:$0x1]  }
   0x5   :  { %v206_v9 = vld [vmem:[%s399_s0 + $0x16] sm:$0x1]   ;;  %v2_v10 = vld [vmem:[%s399_s0] sm:$0x1]   ;;  %s267_s7 = smov 92   ;;  %s268_s8 = smov 88  }
   0x6   :  { %13 = vrot.lane.b32.xlu0 %v198_v2, %s261_s16  ;;  %25 = vrot.lane.b32.xlu1 %v200_v3, %s262_s17  ;;  %4 = vst.msk [vmem:[#allocation0] sm:$0x1] %vm3_vm0, %v2_v10   ;;  %v207_v11 = vld [vmem:[%s399_s0 + $0x15] sm:$0x1]   ;;  %v208_v12 = vld [vmem:[%s399_s0 + $0x14] sm:$0x1]  }
   0x7   :  { %s269_s13 = smov 84   ;;  %s270_s14 = smov 80   ;;  %v209_v13 = vld [vmem:[%s399_s0 + $0x13] sm:$0x1]   ;;  %v210_v14 = vld [vmem:[%s399_s0 + $0x12] sm:$0x1]  }
   0x8   :  { %s271_s19 = smov 76   ;;  %s272_s20 = smov 72   ;;  %v211_v15 = vld [vmem:[%s399_s0 + $0x11] sm:$0x1]   ;;  %v212_v16 = vld [vmem:[%s399_s0 + $0x10] sm:$0x1]  }
   0x9   :  { %s273_s25 = smov 68   ;;  %s274_s26 = smov 64   ;;  %v213_v17 = vld [vmem:[%s399_s0 + $0xf] sm:$0x1]   ;;  %v214_v18 = vld [vmem:[%s399_s0 + $0xe] sm:$0x1]  }
   0xa   :  { %31 = vrot.lane.b32.xlu0 %v201_v4, %s263_s22  ;;  %37 = vrot.lane.b32.xlu1 %v202_v5, %s264_s23  ;;  %s275_s2 = smov 60   ;;  %s276_s3 = smov 56   ;;  %v215_v19 = vld [vmem:[%s399_s0 + $0xd] sm:$0x1]   ;;  %v216_v20 = vld [vmem:[%s399_s0 + $0xc] sm:$0x1]  }
   0xb   :  { %s278_s9 = smov 48   ;;  %v217_v21 = vld [vmem:[%s399_s0 + $0xb] sm:$0x1]   ;;  %v218_v22 = vld [vmem:[%s399_s0 + $0xa] sm:$0x1]   ;;  %s280_s15 = smov 40  }
   0xc   :  { %v219_v23 = vld [vmem:[%s399_s0 + $0x9] sm:$0x1]   ;;  %v220_v24 = vld [vmem:[%s399_s0 + $0x8] sm:$0x1]   ;;  %s282_s21 = smov 32   ;;  %s284_s27 = smov 24  }
   0xd   :  { %v221_v25 = vld [vmem:[%s399_s0 + $0x7] sm:$0x1]   ;;  %v222_v26 = vld [vmem:[%s399_s0 + $0x6] sm:$0x1]   ;;  %v223_v27 = vld [vmem:[%s399_s0 + $0x5] sm:$0x1]  }
   0xe   :  { %43 = vrot.lane.b32.xlu0 %v203_v6, %s265_s28  ;;  %49 = vrot.lane.b32.xlu1 %v204_v7, %s266_s29  ;;  %v224_v28 = vld [vmem:[%s399_s0 + $0x4] sm:$0x1]   ;;  %s286_s4 = smov 16   ;;  %v225_v29 = vld [vmem:[%s399_s0 + $0x3] sm:$0x1]   ;;  %s288_s10 = smov 8  }
   0xf   :  { %v226_v30 = vld [vmem:[%s399_s0 + $0x2] sm:$0x1]   ;;  %v227_v31 = vld [vmem:[%s399_s0 + $0x1] sm:$0x1]   ;;  %s289_s0 = smov 4   ;;  %vm27_vm4 = vcmask 950144  }
  0x10   :  { %vm33_vm5 = vcmask 917344   ;;  %vm39_vm6 = vcmask 884544   ;;  %vm45_vm7 = vcmask 851744   ;;  %vm51_vm8 = vcmask 818944  }
  0x11   :  { %vm57_vm9 = vcmask 786144   ;;  %vm63_vm10 = vcmask 753344   ;;  %vm69_vm11 = vcmask 720544   ;;  %vm75_vm12 = vcmask 687744  }
  0x12   :  { %55 = vrot.lane.b32.xlu0 %v205_v8, %s267_s7  ;;  %61 = vrot.lane.b32.xlu1 %v206_v9, %s268_s8  ;;  %s277_s8 = smov 52   ;;  %vm81_vm13 = vcmask 654944   ;;  %vm87_vm14 = vcmask 622144   ;;  %vm93_vm15 = vcmask 589344   ;;  %vm99_vm0 = vcmask 556544  }
  0x16   :  { %67 = vrot.lane.b32.xlu0 %v207_v11, %s269_s13  ;;  %73 = vrot.lane.b32.xlu1 %v208_v12, %s270_s14  ;;  %s279_s14 = smov 44  }
  0x1a   :  { %79 = vrot.lane.b32.xlu0 %v209_v13, %s271_s19  ;;  %85 = vrot.lane.b32.xlu1 %v210_v14, %s272_s20  ;;  %s281_s20 = smov 36  }
  0x1e   :  { %91 = vrot.lane.b32.xlu0 %v211_v15, %s273_s25  ;;  %97 = vrot.lane.b32.xlu1 %v212_v16, %s274_s26  ;;  %s283_s26 = smov 28  }
  0x22   :  { %103 = vrot.lane.b32.xlu0 %v213_v17, %s275_s2  ;;  %109 = vrot.lane.b32.xlu1 %v214_v18, %s276_s3  ;;  %s285_s3 = smov 20  }
  0x26   :  { %115 = vrot.lane.b32.xlu0 %v215_v19, %s277_s8  ;;  %121 = vrot.lane.b32.xlu1 %v216_v20, %s278_s9  ;;  %s287_s9 = smov 12  }
  0x2a   :  { %127 = vrot.lane.b32.xlu0 %v217_v21, %s279_s14  ;;  %133 = vrot.lane.b32.xlu1 %v218_v22, %s280_s15 }
  0x2e   :  { %139 = vrot.lane.b32.xlu0 %v219_v23, %s281_s20  ;;  %145 = vrot.lane.b32.xlu1 %v220_v24, %s282_s21 }
  0x32   :  { %151 = vrot.lane.b32.xlu0 %v221_v25, %s283_s26  ;;  %157 = vrot.lane.b32.xlu1 %v222_v26, %s284_s27 }
  0x36   :  { %163 = vrot.lane.b32.xlu0 %v223_v27, %s285_s3  ;;  %169 = vrot.lane.b32.xlu1 %v224_v28, %s286_s4 }
  0x3a   :  { %175 = vrot.lane.b32.xlu0 %v225_v29, %s287_s9  ;;  %181 = vrot.lane.b32.xlu1 %v226_v30, %s288_s10 }
  0x3e   :  { %187 = vrot.lane.b32.xlu0 %v227_v31, %s289_s0 }
  0x74   :  { %v8_v32 = vpop.permute.xlu0 %7   ;;  %v20_v33 = vpop.permute.xlu1 %19  }
  0x75   :  { %10 = vst.msk [vmem:[#allocation0] sm:$0x1] %vm9_vm1, %v8_v32   ;;  %vm105_vm1 = vcmask 523744  }
  0x78   :  { %v14_v34 = vpop.permute.xlu0 %13   ;;  %v26_v35 = vpop.permute.xlu1 %25  }
  0x79   :  { %16 = vst.msk [vmem:[#allocation0] sm:$0x1] %vm15_vm2, %v14_v34   ;;  %vm111_vm2 = vcmask 490944  }
  0x7a   :  { %22 = vst.msk [vmem:[#allocation0] sm:$0x1] %vm21_vm3, %v20_v33   ;;  %vm117_vm3 = vcmask 458144  }
  0x7b   :  { %28 = vst.msk [vmem:[#allocation0] sm:$0x1] %vm27_vm4, %v26_v35   ;;  %vm123_vm4 = vcmask 425344  }
  0x7c   :  { %v32_v36 = vpop.permute.xlu0 %31   ;;  %v38_v37 = vpop.permute.xlu1 %37  }
  0x7d   :  { %34 = vst.msk [vmem:[#allocation0] sm:$0x1] %vm33_vm5, %v32_v36   ;;  %vm129_vm5 = vcmask 392544  }
  0x7e   :  { %40 = vst.msk [vmem:[#allocation0] sm:$0x1] %vm39_vm6, %v38_v37   ;;  %vm135_vm6 = vcmask 359744  }
  0x80   :  { %v44_v38 = vpop.permute.xlu0 %43   ;;  %v50_v39 = vpop.permute.xlu1 %49  }
  0x81   :  { %46 = vst.msk [vmem:[#allocation0] sm:$0x1] %vm45_vm7, %v44_v38   ;;  %vm141_vm7 = vcmask 326944  }
  0x82   :  { %52 = vst.msk [vmem:[#allocation0] sm:$0x1] %vm51_vm8, %v50_v39   ;;  %vm147_vm8 = vcmask 294144  }
  0x84   :  { %v56_v40 = vpop.permute.xlu0 %55   ;;  %v62_v41 = vpop.permute.xlu1 %61  }
  0x85   :  { %58 = vst.msk [vmem:[#allocation0] sm:$0x1] %vm57_vm9, %v56_v40   ;;  %vm153_vm9 = vcmask 261344  }
  0x86   :  { %64 = vst.msk [vmem:[#allocation0] sm:$0x1] %vm63_vm10, %v62_v41   ;;  %vm159_vm10 = vcmask 228544  }
  0x88   :  { %v68_v42 = vpop.permute.xlu0 %67   ;;  %v74_v43 = vpop.permute.xlu1 %73  }
  0x89   :  { %70 = vst.msk [vmem:[#allocation0] sm:$0x1] %vm69_vm11, %v68_v42   ;;  %vm165_vm11 = vcmask 195744  }
  0x8a   :  { %76 = vst.msk [vmem:[#allocation0] sm:$0x1] %vm75_vm12, %v74_v43   ;;  %vm171_vm12 = vcmask 162944  }
  0x8c   :  { %v80_v44 = vpop.permute.xlu0 %79   ;;  %v86_v45 = vpop.permute.xlu1 %85  }
  0x8d   :  { %82 = vst.msk [vmem:[#allocation0] sm:$0x1] %vm81_vm13, %v80_v44   ;;  %vm177_vm13 = vcmask 130144  }
  0x8e   :  { %88 = vst.msk [vmem:[#allocation0] sm:$0x1] %vm87_vm14, %v86_v45   ;;  %vm183_vm14 = vcmask 97344  }
  0x90   :  { %v92_v46 = vpop.permute.xlu0 %91   ;;  %v98_v47 = vpop.permute.xlu1 %97  }
  0x91   :  { %94 = vst.msk [vmem:[#allocation0] sm:$0x1] %vm93_vm15, %v92_v46   ;;  %vm189_vm15 = vcmask 64544  }
  0x92   :  { %100 = vst.msk [vmem:[#allocation0] sm:$0x1] %vm99_vm0, %v98_v47  }
  0x94   :  { %v104_v48 = vpop.permute.xlu0 %103   ;;  %v110_v49 = vpop.permute.xlu1 %109  }
  0x95   :  { %106 = vst.msk [vmem:[#allocation0] sm:$0x1] %vm105_vm1, %v104_v48  }
  0x96   :  { %112 = vst.msk [vmem:[#allocation0] sm:$0x1] %vm111_vm2, %v110_v49  }
  0x98   :  { %v116_v50 = vpop.permute.xlu0 %115   ;;  %v122_v51 = vpop.permute.xlu1 %121  }
  0x99   :  { %118 = vst.msk [vmem:[#allocation0] sm:$0x1] %vm117_vm3, %v116_v50  }
  0x9a   :  { %124 = vst.msk [vmem:[#allocation0] sm:$0x1] %vm123_vm4, %v122_v51  }
  0x9c   :  { %v128_v52 = vpop.permute.xlu0 %127   ;;  %v134_v53 = vpop.permute.xlu1 %133  }
  0x9d   :  { %130 = vst.msk [vmem:[#allocation0] sm:$0x1] %vm129_vm5, %v128_v52  }
  0x9e   :  { %136 = vst.msk [vmem:[#allocation0] sm:$0x1] %vm135_vm6, %v134_v53  }
  0xa0   :  { %v140_v54 = vpop.permute.xlu0 %139   ;;  %v146_v55 = vpop.permute.xlu1 %145  }
  0xa1   :  { %142 = vst.msk [vmem:[#allocation0] sm:$0x1] %vm141_vm7, %v140_v54  }
  0xa2   :  { %148 = vst.msk [vmem:[#allocation0] sm:$0x1] %vm147_vm8, %v146_v55  }
  0xa4   :  { %v152_v56 = vpop.permute.xlu0 %151   ;;  %v158_v57 = vpop.permute.xlu1 %157  }
  0xa5   :  { %154 = vst.msk [vmem:[#allocation0] sm:$0x1] %vm153_vm9, %v152_v56  }
  0xa6   :  { %160 = vst.msk [vmem:[#allocation0] sm:$0x1] %vm159_vm10, %v158_v57  }
  0xa8   :  { %v164_v58 = vpop.permute.xlu0 %163   ;;  %v170_v59 = vpop.permute.xlu1 %169  }
  0xa9   :  { %166 = vst.msk [vmem:[#allocation0] sm:$0x1] %vm165_vm11, %v164_v58  }
  0xaa   :  { %172 = vst.msk [vmem:[#allocation0] sm:$0x1] %vm171_vm12, %v170_v59  }
  0xac   :  { %v176_v60 = vpop.permute.xlu0 %175   ;;  %v182_v61 = vpop.permute.xlu1 %181  }
  0xad   :  { %178 = vst.msk [vmem:[#allocation0] sm:$0x1] %vm177_vm13, %v176_v60  }
  0xae   :  { %184 = vst.msk [vmem:[#allocation0] sm:$0x1] %vm183_vm14, %v182_v61  }
  0xb0   :  { %v188_v62 = vpop.permute.xlu0 %187  }
  0xb1   :  { %190 = vst.msk [vmem:[#allocation0] sm:$0x1] %vm189_vm15, %v188_v62  }
  0xb8   :  { %v194_v63 = vld [vmem:[#allocation0] sm:$0x1] }
  0xb9   :  { %196 = vst [vmem:[%s400_s1] sm:$0x1] %v194_v63 }

// kernel: tile.103
= control target key start
LH: loop header
LB: loop body
LE: loop exit
PB: predicated region body
PF: predicated region fallthrough
CT: control target
= control target key end

     0   :  { %s22_s0 = inlined_call_operand.vmem [shape: f32[4], index: 0, kind: input, shape index: {}]   ;;  %s23_s1 = inlined_call_operand.vmem [shape: f32[8,4], index: 1, kind: output, shape index: {}]  }
   0x1   :  { %v4_v0 = vld [vmem:[%s22_s0] ss:$0 sm:$0xff] }
   0x2   :  { %5 = vst [vmem:[%s23_s1] sm:$0xff] %v4_v0 }

// kernel: tile.58
= control target key start
LH: loop header
LB: loop body
LE: loop exit
PB: predicated region body
PF: predicated region fallthrough
CT: control target
= control target key end

     0   :  { %s22_s0 = inlined_call_operand.vmem [shape: f32[32], index: 0, kind: input, shape index: {}]   ;;  %s23_s1 = inlined_call_operand.vmem [shape: f32[4,32], index: 1, kind: output, shape index: {}]  }
   0x1   :  { %v4_v0 = vld [vmem:[%s22_s0] ss:$0 sm:$0xff] }
   0x2   :  { %5 = vst [vmem:[%s23_s1] sm:$0xf] %v4_v0 }

// kernel: tile.59
= control target key start
LH: loop header
LB: loop body
LE: loop exit
PB: predicated region body
PF: predicated region fallthrough
CT: control target
= control target key end

     0   :  { %vm7_vm0 = vcmask 261120   ;;  %s37_s8 = smov 32   ;;  %s38_s9 = smov 64   ;;  %vm13_vm1 = vcmask 1048320   ;;  %vm19_vm2 = vcmask 785920   ;;  %vm25_vm3 = vcmask 523520   ;;  %s55_s0 = inlined_call_operand.vmem [shape: f32[4,32], index: 0, kind: input, shape index: {}]   ;;  %s56_s1 = inlined_call_operand.vmem [shape: f32[128], index: 1, kind: output, shape index: {}]  }
   0x1   :  { %v4_v0 = vld [vmem:[%s55_s0] sm:$0xf]  ;;  %s36_s0 = smov 96  }
   0x2   :  { %5 = vst [vmem:[#allocation1] sm:$0xf] %v4_v0 }
   0x9   :  { %v10_v1 = vld [vmem:[#allocation1 + $0x3] sm:$0x1]   ;;  %v22_v2 = vld [vmem:[#allocation1 + $0x1] sm:$0x1]   ;;  %v6_v3 = vld [vmem:[#allocation1] sm:$0x1]  }
   0xa   :  { %11 = vrot.lane.b32.xlu0 %v10_v1, %s36_s0  ;;  %23 = vrot.lane.b32.xlu1 %v22_v2, %s37_s8  ;;  %v16_v4 = vld [vmem:[#allocation1 + $0x2] sm:$0x1]   ;;  %8 = vst.msk [vmem:[#allocation0] sm:$0x1] %vm7_vm0, %v6_v3  }
   0xe   :  { %17 = vrot.lane.b32.xlu0 %v16_v4, %s38_s9 }
  0x7c   :  { %v12_v5 = vpop.permute.xlu0 %11   ;;  %v24_v6 = vpop.permute.xlu1 %23  }
  0x7d   :  { %14 = vst.msk [vmem:[#allocation0] sm:$0x1] %vm13_vm1, %v12_v5  }
  0x80   :  { %v18_v7 = vpop.permute.xlu0 %17  }
  0x81   :  { %20 = vst.msk [vmem:[#allocation0] sm:$0x1] %vm19_vm2, %v18_v7  }
  0x82   :  { %26 = vst.msk [vmem:[#allocation0] sm:$0x1] %vm25_vm3, %v24_v6  }
  0x89   :  { %v30_v8 = vld [vmem:[#allocation0] sm:$0x1] }
  0x8a   :  { %32 = vst [vmem:[%s56_s1] sm:$0x1] %v30_v8 }

// kernel: tile.73
= control target key start
LH: loop header
LB: loop body
LE: loop exit
PB: predicated region body
PF: predicated region fallthrough
CT: control target
= control target key end

     0   :  { %s22_s0 = inlined_call_operand.vmem [shape: f32[16], index: 0, kind: input, shape index: {}]   ;;  %s23_s1 = inlined_call_operand.vmem [shape: f32[4,16], index: 1, kind: output, shape index: {}]  }
   0x1   :  { %v4_v0 = vld [vmem:[%s22_s0] ss:$0 sm:$0xff] }
   0x2   :  { %5 = vst [vmem:[%s23_s1] sm:$0xf] %v4_v0 }

// kernel: tile.74
= control target key start
LH: loop header
LB: loop body
LE: loop exit
PB: predicated region body
PF: predicated region fallthrough
CT: control target
= control target key end

     0   :  { %vm7_vm0 = vcmask 130048   ;;  %s37_s8 = smov 16   ;;  %s38_s9 = smov 32   ;;  %vm13_vm1 = vcmask 523648   ;;  %vm19_vm2 = vcmask 392448   ;;  %vm25_vm3 = vcmask 261248   ;;  %s55_s0 = inlined_call_operand.vmem [shape: f32[4,16], index: 0, kind: input, shape index: {}]   ;;  %s56_s1 = inlined_call_operand.vmem [shape: f32[64], index: 1, kind: output, shape index: {}]  }
   0x1   :  { %v4_v0 = vld [vmem:[%s55_s0] sm:$0xf]  ;;  %s36_s0 = smov 48  }
   0x2   :  { %5 = vst [vmem:[#allocation1] sm:$0xf] %v4_v0 }
   0x9   :  { %v10_v1 = vld [vmem:[#allocation1 + $0x3] sm:$0x1]   ;;  %v22_v2 = vld [vmem:[#allocation1 + $0x1] sm:$0x1]   ;;  %v6_v3 = vld [vmem:[#allocation1] sm:$0x1]  }
   0xa   :  { %11 = vrot.lane.b32.xlu0 %v10_v1, %s36_s0  ;;  %23 = vrot.lane.b32.xlu1 %v22_v2, %s37_s8  ;;  %v16_v4 = vld [vmem:[#allocation1 + $0x2] sm:$0x1]   ;;  %8 = vst.msk [vmem:[#allocation0] sm:$0x1] %vm7_vm0, %v6_v3  }
   0xe   :  { %17 = vrot.lane.b32.xlu0 %v16_v4, %s38_s9 }
  0x7c   :  { %v12_v5 = vpop.permute.xlu0 %11   ;;  %v24_v6 = vpop.permute.xlu1 %23  }
  0x7d   :  { %14 = vst.msk [vmem:[#allocation0] sm:$0x1] %vm13_vm1, %v12_v5  }
  0x80   :  { %v18_v7 = vpop.permute.xlu0 %17  }
  0x81   :  { %20 = vst.msk [vmem:[#allocation0] sm:$0x1] %vm19_vm2, %v18_v7  }
  0x82   :  { %26 = vst.msk [vmem:[#allocation0] sm:$0x1] %vm25_vm3, %v24_v6  }
  0x89   :  { %v30_v8 = vld [vmem:[#allocation0] sm:$0x1] }
  0x8a   :  { %32 = vst [vmem:[%s56_s1] sm:$0x1] %v30_v8 }

// kernel: model_forward.1
= control target key start
LH: loop header
LB: loop body
LE: loop exit
PB: predicated region body
PF: predicated region fallthrough
CT: control target
= control target key end

     0   :  { %v2080_v0 = vmov 0.0|0.0   ;;  %vm2081_vm0 = vmmov 0   ;;  %v2082_v4 = vmov 0.0   ;;  %s2083_s21 = smov 96   ;;  %vm1004_vm3 = vcmask 523264   ;;  %s2084_s25 = smov 64   ;;  %s2823_s1 = inlined_call_operand.vmem [shape: f32[128,928], index: 1, kind: input, shape index: {}]   ;;  %s2824_s0 = inlined_call_operand.vmem [shape: f32[8,128], index: 0, kind: input, shape index: {}]   ;;  %s2825_s4 = inlined_call_operand.vmem [shape: f32[1,1056], index: 4, kind: input, shape index: {}]   ;;  %s2826_s2 = inlined_call_operand.vmem [shape: f32[256,64], index: 2, kind: input, shape index: {}]   ;;  %s2827_s3 = inlined_call_operand.vmem [shape: f32[64,96], index: 3, kind: input, shape index: {}]   ;;  %s2828_s5 = inlined_call_operand.vmem [shape: f32[8,32], index: 5, kind: output, shape index: {}]  }
   0x1   :  { %1742 = vmatprep.subr.bf16.mxu0 %v2080_v0  ;;  %v21_v1 = vld [vmem:[%s2823_s1 + $0x28] sm:$0xff]  ;;  %1472 = vmatprep.mubr.msk.f32.mxu0 %vm2081_vm0, %v2082_v4  ;;  %v2187_v26 = vld [vmem:[%s2824_s0] sm:$0xff]  ;;  %v197_v27 = vld [vmem:[%s2823_s1 + $0x38] sm:$0xff]  ;;  %s2085_s26 = smov 32   ;;  %vm1245_vm6 = vcmask 261120  }
   0x2   :  { %v22_v2 = vld [vmem:[%s2823_s1 + $0x68] sm:$0xff]  ;;  %1766 = vmatprep.subr.bf16.mxu1 %v2080_v0  ;;  %1507 = vmatprep.mubr.msk.f32.mxu1 %vm2081_vm0, %v2082_v4  ;;  %v198_v28 = vld [vmem:[%s2823_s1 + $0x78] sm:$0xff]  ;;  %v360_v53 = vld [vmem:[%s2823_s1] sm:$0xff] }
   0x3   :  { %v23_v3 = vld [vmem:[%s2823_s1 + $0xa8] sm:$0xff]  ;;  %v1743_v5 = vpack.c.bf16 %v22_v2, %v21_v1  ;;  %v2200_v29 = vpack.c.bf16 %v198_v28, %v197_v27  ;;  %v199_v30 = vld [vmem:[%s2823_s1 + $0xb8] sm:$0xff]  ;;  %v363_v55 = vld [vmem:[%s2823_s1 + $0x40] sm:$0xff] }
   0x4   :  { %v24_v6 = vld [vmem:[%s2823_s1 + $0xe8] sm:$0xff]  ;;  %v200_v31 = vld [vmem:[%s2823_s1 + $0xf8] sm:$0xff]  ;;  %v1840_v56 = vpack.c.bf16 %v363_v55, %v360_v53  ;;  %v366_v59 = vld [vmem:[%s2823_s1 + $0x80] sm:$0xff] }
   0x5   :  { %1744 = vmatpush3.bf16.msra.mxu0 %v1743_v5  ;;  %v1746_v7 = vpack.c.bf16 %v24_v6, %v23_v3  ;;  %1768 = vmatpush3.bf16.msra.mxu1 %v1743_v5  ;;  %v25_v8 = vld [vmem:[%s2823_s1 + $0x128] sm:$0xff]  ;;  %v2210_v32 = vpack.c.bf16 %v200_v31, %v199_v30  ;;  %v201_v33 = vld [vmem:[%s2823_s1 + $0x138] sm:$0xff]  ;;  %v369_v61 = vld [vmem:[%s2823_s1 + $0xc0] sm:$0xff] }
   0x6   :  { %1745 = vmatprep.subr.bf16.mxu0 %v2080_v0  ;;  %v26_v9 = vld [vmem:[%s2823_s1 + $0x168] sm:$0xff]  ;;  %1769 = vmatprep.subr.bf16.mxu1 %v2080_v0  ;;  %v202_v34 = vld [vmem:[%s2823_s1 + $0x178] sm:$0xff]  ;;  %v1844_v62 = vpack.c.bf16 %v369_v61, %v366_v59  ;;  %v372_v3 = vld [vmem:[%s2823_s1 + $0x100] sm:$0xff] }
   0x7   :  { %v1749_v10 = vpack.c.bf16 %v26_v9, %v25_v8  ;;  %v27_v11 = vld [vmem:[%s2823_s1 + $0x1a8] sm:$0xff]  ;;  %v1797_v35 = vpack.c.bf16 %v202_v34, %v201_v33  ;;  %v203_v36 = vld [vmem:[%s2823_s1 + $0x1b8] sm:$0xff]  ;;  %v375_v5 = vld [vmem:[%s2823_s1 + $0x140] sm:$0xff] }
   0x8   :  { %v28_v12 = vld [vmem:[%s2823_s1 + $0x1e8] sm:$0xff]  ;;  %v204_v37 = vld [vmem:[%s2823_s1 + $0x1f8] sm:$0xff]  ;;  %v1848_v6 = vpack.c.bf16 %v375_v5, %v372_v3  ;;  %v383_v27 = vld [vmem:[%s2823_s1 + $0x1d0] sm:$0xff] }
   0x9   :  { %1747 = vmatpush3.bf16.msra.mxu0 %v1746_v7  ;;  %1771 = vmatpush3.bf16.msra.mxu1 %v1746_v7  ;;  %v1752_v13 = vpack.c.bf16 %v28_v12, %v27_v11  ;;  %v29_v14 = vld [vmem:[%s2823_s1 + $0x228] sm:$0xff]  ;;  %v1800_v38 = vpack.c.bf16 %v204_v37, %v203_v36  ;;  %v205_v39 = vld [vmem:[%s2823_s1 + $0x238] sm:$0xff]  ;;  %v362_v11 = vld [vmem:[%s2823_s1 + $0x10] sm:$0xff] }
   0xa   :  { %1748 = vmatprep.subr.bf16.mxu0 %v2080_v0  ;;  %1772 = vmatprep.subr.bf16.mxu1 %v2080_v0  ;;  %v30_v15 = vld [vmem:[%s2823_s1 + $0x268] sm:$0xff]  ;;  %v206_v40 = vld [vmem:[%s2823_s1 + $0x278] sm:$0xff]  ;;  %v365_v12 = vld [vmem:[%s2823_s1 + $0x50] sm:$0xff] }
   0xb   :  { %v1755_v16 = vpack.c.bf16 %v30_v15, %v29_v14  ;;  %v31_v17 = vld [vmem:[%s2823_s1 + $0x2a8] sm:$0xff]  ;;  %v1803_v41 = vpack.c.bf16 %v206_v40, %v205_v39  ;;  %v207_v42 = vld [vmem:[%s2823_s1 + $0x2b8] sm:$0xff]  ;;  %v368_v14 = vld [vmem:[%s2823_s1 + $0x90] sm:$0xff] }
   0xc   :  { %v32_v18 = vld [vmem:[%s2823_s1 + $0x2e8] sm:$0xff]  ;;  %v208_v43 = vld [vmem:[%s2823_s1 + $0x2f8] sm:$0xff]  ;;  %v371_v15 = vld [vmem:[%s2823_s1 + $0xd0] sm:$0xff] }
   0xd   :  { %1750 = vmatpush3.bf16.msra.mxu0 %v1749_v10  ;;  %1774 = vmatpush3.bf16.msra.mxu1 %v1749_v10  ;;  %v1758_v19 = vpack.c.bf16 %v32_v18, %v31_v17  ;;  %v33_v20 = vld [vmem:[%s2823_s1 + $0x328] sm:$0xff]  ;;  %v1806_v44 = vpack.c.bf16 %v208_v43, %v207_v42  ;;  %v209_v45 = vld [vmem:[%s2823_s1 + $0x338] sm:$0xff]  ;;  %v374_v17 = vld [vmem:[%s2823_s1 + $0x110] sm:$0xff] }
   0xe   :  { %1751 = vmatprep.subr.bf16.mxu0 %v2080_v0  ;;  %1775 = vmatprep.subr.bf16.mxu1 %v2080_v0  ;;  %v34_v21 = vld [vmem:[%s2823_s1 + $0x368] sm:$0xff]  ;;  %v210_v46 = vld [vmem:[%s2823_s1 + $0x378] sm:$0xff]  ;;  %v377_v18 = vld [vmem:[%s2823_s1 + $0x150] sm:$0xff] }
   0xf   :  { %v1761_v22 = vpack.c.bf16 %v34_v21, %v33_v20  ;;  %v35_v23 = vld [vmem:[%s2823_s1 + $0x3a8] sm:$0xff]  ;;  %v1809_v47 = vpack.c.bf16 %v210_v46, %v209_v45  ;;  %v211_v48 = vld [vmem:[%s2823_s1 + $0x3b8] sm:$0xff]  ;;  %v387_v33 = vld [vmem:[%s2823_s1 + $0x240] sm:$0xff] }
  0x10   :  { %v36_v24 = vld [vmem:[%s2823_s1 + $0x3e8] sm:$0xff]  ;;  %v212_v49 = vld [vmem:[%s2823_s1 + $0x3f8] sm:$0xff]  ;;  %v386_v34 = vld [vmem:[%s2823_s1 + $0x210] sm:$0xff] }
  0x11   :  { %1753 = vmatpush3.bf16.msra.mxu0 %v1752_v13  ;;  %1777 = vmatpush3.bf16.msra.mxu1 %v1752_v13  ;;  %v1764_v25 = vpack.c.bf16 %v36_v24, %v35_v23  ;;  %v1812_v50 = vpack.c.bf16 %v212_v49, %v211_v48  ;;  %v361_v51 = vld [vmem:[%s2823_s1 + $0x8] sm:$0xff]  ;;  %v1871_v13 = vpack.c.bf16 %v365_v12, %v362_v11  ;;  %v378_v23 = vld [vmem:[%s2823_s1 + $0x180] sm:$0xff]  ;;  %v389_v36 = vld [vmem:[%s2823_s1 + $0x250] sm:$0xff] }
  0x12   :  { %1754 = vmatprep.subr.bf16.mxu0 %v2080_v0  ;;  %1778 = vmatprep.subr.bf16.mxu1 %v2080_v0  ;;  %v364_v52 = vld [vmem:[%s2823_s1 + $0x48] sm:$0xff]  ;;  %v381_v24 = vld [vmem:[%s2823_s1 + $0x1c0] sm:$0xff]  ;;  %v1883_v39 = vpack.c.bf16 %v389_v36, %v386_v34  ;;  %v392_v43 = vld [vmem:[%s2823_s1 + $0x290] sm:$0xff] }
  0x13   :  { %v1838_v54 = vpack.c.bf16 %v364_v52, %v361_v51  ;;  %v367_v57 = vld [vmem:[%s2823_s1 + $0x88] sm:$0xff]  ;;  %v393_v42 = vld [vmem:[%s2823_s1 + $0x2c0] sm:$0xff]  ;;  %v395_v45 = vld [vmem:[%s2823_s1 + $0x2d0] sm:$0xff] }
  0x14   :  { %v370_v58 = vld [vmem:[%s2823_s1 + $0xc8] sm:$0xff]  ;;  %v1886_v48 = vpack.c.bf16 %v395_v45, %v392_v43  ;;  %v399_v51 = vld [vmem:[%s2823_s1 + $0x340] sm:$0xff]  ;;  %v398_v52 = vld [vmem:[%s2823_s1 + $0x310] sm:$0xff] }
  0x15   :  { %1756 = vmatpush3.bf16.msra.mxu0 %v1755_v16  ;;  %1780 = vmatpush3.bf16.msra.mxu1 %v1755_v16  ;;  %v1842_v60 = vpack.c.bf16 %v370_v58, %v367_v57  ;;  %v373_v63 = vld [vmem:[%s2823_s1 + $0x108] sm:$0xff]  ;;  %v1874_v16 = vpack.c.bf16 %v371_v15, %v368_v14  ;;  %v401_v53 = vld [vmem:[%s2823_s1 + $0x350] sm:$0xff]  ;;  %v402_v59 = vld [vmem:[%s2823_s1 + $0x380] sm:$0xff] }
  0x16   :  { %1757 = vmatprep.subr.bf16.mxu0 %v2080_v0  ;;  %1781 = vmatprep.subr.bf16.mxu1 %v2080_v0  ;;  %v376_v1 = vld [vmem:[%s2823_s1 + $0x148] sm:$0xff]  ;;  %v1889_v57 = vpack.c.bf16 %v401_v53, %v398_v52  ;;  %v404_v61 = vld [vmem:[%s2823_s1 + $0x390] sm:$0xff]  ;;  %v1252_v12 = vld [vmem:[%s2825_s4 + $0x6] ss:$0 sm:$0xff] }
  0x17   :  { %v1846_v2 = vpack.c.bf16 %v376_v1, %v373_v63  ;;  %v379_v20 = vld [vmem:[%s2823_s1 + $0x188] sm:$0xff]  ;;  %v586_v34 = vld [vmem:[%s2823_s1 + $0x330] sm:$0xff]  ;;  %v408_v43 = vld [vmem:[%s2825_s4] sm:$0x7] }
  0x18   :  { %v382_v21 = vld [vmem:[%s2823_s1 + $0x1c8] sm:$0xff] }
  0x19   :  { %1759 = vmatpush3.bf16.msra.mxu0 %v1758_v19  ;;  %1783 = vmatpush3.bf16.msra.mxu1 %v1758_v19  ;;  %v1877_v19 = vpack.c.bf16 %v377_v18, %v374_v17  ;;  %v388_v30 = vld [vmem:[%s2823_s1 + $0x248] sm:$0xff]  ;;  %v575_v17 = vld [vmem:[%s2823_s1 + $0x70] sm:$0xff] }
  0x1a   :  { %1760 = vmatprep.subr.bf16.mxu0 %v2080_v0  ;;  %1784 = vmatprep.subr.bf16.mxu1 %v2080_v0  ;;  %v391_v37 = vld [vmem:[%s2823_s1 + $0x288] sm:$0xff] }
  0x1b   :  { %v397_v46 = vld [vmem:[%s2823_s1 + $0x308] sm:$0xff] }
  0x1c   :  { %v406_v55 = vld [vmem:[%s2823_s1 + $0x3c8] sm:$0xff] }
  0x1d   :  { %1762 = vmatpush3.bf16.msra.mxu0 %v1761_v22  ;;  %1786 = vmatpush3.bf16.msra.mxu1 %v1761_v22  ;;  %v1850_v22 = vpack.c.bf16 %v382_v21, %v379_v20  ;;  %v577_v20 = vld [vmem:[%s2823_s1 + $0xf0] sm:$0xff] }
  0x1e   :  { %1763 = vmatprep.subr.bf16.mxu0 %v2080_v0  ;;  %1787 = vmatprep.subr.bf16.mxu1 %v2080_v0 }
  0x21   :  { %1765 = vmatpush3.bf16.msra.mxu0 %v1764_v25  ;;  %1789 = vmatpush3.bf16.msra.mxu1 %v1764_v25  ;;  %v380_v25 = vld [vmem:[%s2823_s1 + $0x190] sm:$0xff] }
  0x22   :  { %1814 = vmatprep.subr.bf16.mxu1 %v2080_v0  ;;  %1790 = vmatprep.subr.bf16.mxu0 %v2080_v0  ;;  %v1880_v28 = vpack.c.bf16 %v383_v27, %v380_v25  ;;  %v580_v25 = vld [vmem:[%s2823_s1 + $0x1b0] sm:$0xff] }
  0x24   :  { %1473 = vmatmul.mubr.f32.vlgmr.msra.gmra.mrb[0].mxu0 %v2187_v26 }
  0x25   :  { %1542 = vmatprep.mubr.msk.f32.mxu0 %vm2081_vm0, %v2082_v4  ;;  %1792 = vmatpush3.bf16.msra.mxu0 %v2200_v29 }
  0x26   :  { %1793 = vmatprep.subr.bf16.mxu0 %v2080_v0 }
  0x29   :  { %1795 = vmatpush3.bf16.msra.mxu0 %v2210_v32 }
  0x2a   :  { %1796 = vmatprep.subr.bf16.mxu0 %v2080_v0 }
  0x2d   :  { %1798 = vmatpush3.bf16.msra.mxu0 %v1797_v35 }
  0x2e   :  { %1799 = vmatprep.subr.bf16.mxu0 %v2080_v0 }
  0x31   :  { %1801 = vmatpush3.bf16.msra.mxu0 %v1800_v38 }
  0x32   :  { %1802 = vmatprep.subr.bf16.mxu0 %v2080_v0 }
  0x35   :  { %1804 = vmatpush3.bf16.msra.mxu0 %v1803_v41 }
  0x36   :  { %1805 = vmatprep.subr.bf16.mxu0 %v2080_v0 }
  0x39   :  { %1807 = vmatpush3.bf16.msra.mxu0 %v1806_v44 }
  0x3a   :  { %1808 = vmatprep.subr.bf16.mxu0 %v2080_v0 }
  0x3d   :  { %1810 = vmatpush3.bf16.msra.mxu0 %v1809_v47 }
  0x3e   :  { %1811 = vmatprep.subr.bf16.mxu0 %v2080_v0 }
  0x41   :  { %1813 = vmatpush3.bf16.msra.mxu0 %v1812_v50 }
  0x42   :  { %1839 = vmatprep.subr.bf16.mxu0 %v1838_v54  ;;  %v403_v54 = vld [vmem:[%s2823_s1 + $0x388] sm:$0xff] }
  0x43   :  { %v1866_v58 = vpack.c.bf16 %v406_v55, %v403_v54 }
  0x44   :  { %1543 = vmatmul.mubr.f32.vlgmr.msra.gmra.mrb[2].mxu0 %v2187_v26 }
  0x45   :  { %489 = vmatprep.mubr.f32.mxu0 %v2082_v4  ;;  %1841 = vmatpush1.bf16.msra.mxu0 %v1840_v56 }
  0x46   :  { %1843 = vmatprep.subr.bf16.mxu0 %v1842_v60  ;;  %v405_v60 = vld [vmem:[%s2823_s1 + $0x3c0] sm:$0xff] }
  0x47   :  { %v1868_v63 = vpack.c.bf16 %v405_v60, %v402_v59 }
  0x49   :  { %1845 = vmatpush1.bf16.msra.mxu0 %v1844_v62  ;;  %v407_v62 = vld [vmem:[%s2823_s1 + $0x3d0] sm:$0xff] }
  0x4a   :  { %1847 = vmatprep.subr.bf16.mxu0 %v1846_v2  ;;  %v1892_v1 = vpack.c.bf16 %v407_v62, %v404_v61  ;;  %v735_v62 = vld [vmem:[%s2823_s1 + $0x20] sm:$0xff] }
  0x4d   :  { %1849 = vmatpush1.bf16.msra.mxu0 %v1848_v6 }
  0x4e   :  { %1851 = vmatprep.subr.bf16.mxu0 %v1850_v22  ;;  %v578_v22 = vld [vmem:[%s2823_s1 + $0x130] sm:$0xff] }
  0xf7   :  { %v103_v7 = vpop.f32.mrb[0].mxu0 }
  0xf8   :  { %v2294_v8 = vsub.f32 %v2187_v26, %v103_v7  ;;  %v1474_v9 = vpop.f32.mrb[1].mxu0  ;;  %v1852_v26 = vpack.c.bf16 %v381_v24, %v378_v23  ;;  %v579_v23 = vld [vmem:[%s2823_s1 + $0x170] sm:$0xff] }
  0xf9   :  { %v1901_v24 = vpack.c.bf16 %v579_v23, %v578_v22  ;;  %v746_v23 = vld [vmem:[%s2823_s1 + $0x198] sm:$0xff] }
  0xfa   :  { %v108_v10 = vmul.f32 %v2294_v8, %v2294_v8  ;;  %1853 = vmatpush1.bf16.msra.mxu0 %v1852_v26  ;;  %v581_v26 = vld [vmem:[%s2823_s1 + $0x1f0] sm:$0xff] }
  0xfb   :  { %v1904_v27 = vpack.c.bf16 %v581_v26, %v580_v25 }
  0xfc   :  { %1508 = vmatmul.mubr.f32.vlgmr.msra.gmra.mrb[0].mxu1 %v108_v10 }
  0xfd   :  { %1816 = vmatpush3.bf16.msra.mxu1 %v2200_v29  ;;  %1577 = vmatprep.mubr.msk.f32.mxu1 %vm2081_vm0, %v2082_v4  ;;  %v385_v29 = vld [vmem:[%s2823_s1 + $0x208] sm:$0xff] }
  0xfe   :  { %1817 = vmatprep.subr.bf16.mxu1 %v2080_v0  ;;  %v1854_v31 = vpack.c.bf16 %v388_v30, %v385_v29  ;;  %v583_v29 = vld [vmem:[%s2823_s1 + $0x270] sm:$0xff] }
 0x100   :  { %1855 = vmatprep.subr.bf16.mxu0 %v1854_v31  ;;  %v584_v31 = vld [vmem:[%s2823_s1 + $0x2b0] sm:$0xff] }
 0x101   :  { %1819 = vmatpush3.bf16.msra.mxu1 %v2210_v32  ;;  %v384_v32 = vld [vmem:[%s2823_s1 + $0x200] sm:$0xff] }
 0x102   :  { %1820 = vmatprep.subr.bf16.mxu1 %v2080_v0 }
 0x105   :  { %1822 = vmatpush3.bf16.msra.mxu1 %v1797_v35  ;;  %v1856_v35 = vpack.c.bf16 %v387_v33, %v384_v32  ;;  %v585_v32 = vld [vmem:[%s2823_s1 + $0x2f0] sm:$0xff] }
 0x106   :  { %1823 = vmatprep.subr.bf16.mxu1 %v2080_v0  ;;  %v1910_v33 = vpack.c.bf16 %v585_v32, %v584_v31  ;;  %v753_v31 = vld [vmem:[%s2823_s1 + $0x260] sm:$0xff] }
 0x107   :  { %1857 = vmatpush1.bf16.msra.mxu0 %v1856_v35  ;;  %v587_v35 = vld [vmem:[%s2823_s1 + $0x370] sm:$0xff] }
 0x108   :  { %v1913_v36 = vpack.c.bf16 %v587_v35, %v586_v34  ;;  %v752_v34 = vld [vmem:[%s2823_s1 + $0x258] sm:$0xff] }
 0x109   :  { %1825 = vmatpush3.bf16.msra.mxu1 %v1800_v38  ;;  %v394_v38 = vld [vmem:[%s2823_s1 + $0x2c8] sm:$0xff] }
 0x10a   :  { %1826 = vmatprep.subr.bf16.mxu1 %v2080_v0  ;;  %v1858_v40 = vpack.c.bf16 %v394_v38, %v391_v37  ;;  %v588_v37 = vld [vmem:[%s2823_s1 + $0x3b0] sm:$0xff] }
 0x10b   :  { %v589_v38 = vld [vmem:[%s2823_s1 + $0x3f0] sm:$0xff] }
 0x10c   :  { %1859 = vmatprep.subr.bf16.mxu0 %v1858_v40  ;;  %v410_v40 = vlaneseq }
 0x10d   :  { %1828 = vmatpush3.bf16.msra.mxu1 %v1803_v41  ;;  %v390_v41 = vld [vmem:[%s2823_s1 + $0x280] sm:$0xff] }
 0x10e   :  { %1829 = vmatprep.subr.bf16.mxu1 %v2080_v0 }
 0x111   :  { %1831 = vmatpush3.bf16.msra.mxu1 %v1806_v44  ;;  %v1860_v44 = vpack.c.bf16 %v393_v42, %v390_v41  ;;  %v2506_v41 = vshrl.u32 %v410_v40, 7  ;;  %v756_v40 = vld [vmem:[%s2823_s1 + $0x2d8] sm:$0xff] }
 0x112   :  { %1832 = vmatprep.subr.bf16.mxu1 %v2080_v0 }
 0x113   :  { %1861 = vmatpush1.bf16.msra.mxu0 %v1860_v44  ;;  %v420_v42 = vsub.s32 2, %v2506_v41  ;;  %v416_v53 = vsub.s32 1, %v2506_v41  ;;  %v412_v54 = vsub.s32 0, %v2506_v41 }
 0x115   :  { %1834 = vmatpush3.bf16.msra.mxu1 %v1809_v47  ;;  %v400_v47 = vld [vmem:[%s2823_s1 + $0x348] sm:$0xff]  ;;  %v421_v44 = vrot.slane %v408_v43, %v420_v42  ;;  %v417_v55 = vrot.slane %v408_v43, %v416_v53  ;;  %v759_v42 = vld [vmem:[%s2823_s1 + $0x320] sm:$0xff] }
 0x116   :  { %1835 = vmatprep.subr.bf16.mxu1 %v2080_v0  ;;  %v1862_v49 = vpack.c.bf16 %v400_v47, %v397_v46 }
 0x117   :  { %v2429_v2 = vpop.f32.mrb[2].mxu0 }
 0x118   :  { %1863 = vmatprep.subr.bf16.mxu0 %v1862_v49  ;;  %v1544_v3 = vpop.f32.mrb[3].mxu0 }
 0x119   :  { %1837 = vmatpush3.bf16.msra.mxu1 %v1812_v50  ;;  %v396_v50 = vld [vmem:[%s2823_s1 + $0x300] sm:$0xff] }
 0x11a   :  { %1870 = vmatprep.subr.bf16.mxu1 %v2080_v0  ;;  %v1864_v56 = vpack.c.bf16 %v399_v51, %v396_v50 }
 0x11c   :  { %1578 = vmatmul.mubr.f32.vlgmr.msra.gmra.mrb[2].mxu1 %v108_v10  ;;  %1865 = vmatpush1.bf16.msra.mxu0 %v1864_v56  ;;  %v1251_v10 = vld [vmem:[%s2825_s4 + $0x5] ss:$0 sm:$0xff]  ;;  %v413_v56 = vrot.slane %v408_v43, %v412_v54 }
 0x11d   :  { %1872 = vmatpush3.bf16.msra.mxu1 %v1871_v13  ;;  %1612 = vmatprep.mubr.msk.f32.mxu1 %vm2081_vm0, %v2082_v4 }
 0x11e   :  { %1873 = vmatprep.subr.bf16.mxu1 %v2080_v0  ;;  %1867 = vmatprep.subr.bf16.mxu0 %v1866_v58 }
 0x120   :  { %1869 = vmatpush1.bf16.msra.mxu0 %v1868_v63  ;;  %v737_v63 = vld [vmem:[%s2823_s1 + $0x60] sm:$0xff] }
 0x121   :  { %1875 = vmatpush3.bf16.msra.mxu1 %v1874_v16  ;;  %1894 = vmatprep.subr.bf16.mxu0 %v2080_v0  ;;  %v1942_v3 = vpack.c.bf16 %v737_v63, %v735_v62  ;;  %v873_v62 = vld [vmem:[%s2826_s2 + $0x90] sm:$0xff]  ;;  %v874_v63 = vld [vmem:[%s2826_s2 + $0x98] sm:$0xff] }
 0x122   :  { %1876 = vmatprep.subr.bf16.mxu1 %v2080_v0 }
 0x125   :  { %1878 = vmatpush3.bf16.msra.mxu1 %v1877_v19  ;;  %v576_v19 = vld [vmem:[%s2823_s1 + $0xb0] sm:$0xff] }
 0x126   :  { %1879 = vmatprep.subr.bf16.mxu1 %v2080_v0  ;;  %v1898_v21 = vpack.c.bf16 %v577_v20, %v576_v19  ;;  %v747_v19 = vld [vmem:[%s2823_s1 + $0x1a0] sm:$0xff] }
 0x127   :  { %v749_v20 = vld [vmem:[%s2823_s1 + $0x1e0] sm:$0xff] }
 0x128   :  { %v1954_v22 = vpack.c.bf16 %v749_v20, %v747_v19  ;;  %v862_v19 = vld [vmem:[%s2826_s2 + $0x38] sm:$0xff]  ;;  %v879_v20 = vld [vmem:[%s2826_s2 + $0xc0] sm:$0xff] }
 0x129   :  { %1881 = vmatpush3.bf16.msra.mxu1 %v1880_v28  ;;  %v582_v28 = vld [vmem:[%s2823_s1 + $0x230] sm:$0xff] }
 0x12a   :  { %1882 = vmatprep.subr.bf16.mxu1 %v2080_v0  ;;  %v1907_v30 = vpack.c.bf16 %v583_v29, %v582_v28 }
 0x12d   :  { %1884 = vmatpush3.bf16.msra.mxu1 %v1883_v39  ;;  %v1916_v39 = vpack.c.bf16 %v589_v38, %v588_v37  ;;  %v757_v37 = vld [vmem:[%s2823_s1 + $0x2e0] sm:$0xff] }
 0x12e   :  { %1885 = vmatprep.subr.bf16.mxu1 %v2080_v0 }
 0x131   :  { %1887 = vmatpush3.bf16.msra.mxu1 %v1886_v48 }
 0x132   :  { %1888 = vmatprep.subr.bf16.mxu1 %v2080_v0 }
 0x135   :  { %1890 = vmatpush3.bf16.msra.mxu1 %v1889_v57 }
 0x136   :  { %1891 = vmatprep.subr.bf16.mxu1 %v2080_v0 }
 0x139   :  { %1893 = vmatpush3.bf16.msra.mxu1 %v1892_v1  ;;  %v734_v1 = vld [vmem:[%s2823_s1 + $0x18] sm:$0xff] }
 0x13a   :  { %1918 = vmatprep.subr.bf16.mxu1 %v2080_v0 }
 0x1cf   :  { %v175_v5 = vpop.f32.mrb[0].mxu1 }
 0x1d0   :  { %v176_v6 = vadd.f32 1e-05, %v175_v5  ;;  %v1509_v7 = vpop.f32.mrb[1].mxu1  ;;  %v736_v5 = vld [vmem:[%s2823_s1 + $0x58] sm:$0xff] }
 0x1d1   :  { %v741_v7 = vld [vmem:[%s2823_s1 + $0xe0] sm:$0xff] }
 0x1d2   :  { %2068 = vrsqrt.f32 %v176_v6  ;;  %v739_v6 = vld [vmem:[%s2823_s1 + $0xa0] sm:$0xff] }
 0x1dc   :  { %v2069_v9 = vpop.eup %2068 }
 0x1dd   :  { %v180_v11 = vmul.f32 %v2069_v9, %v2294_v8  ;;  %v574_v8 = vld [vmem:[%s2823_s1 + $0x30] sm:$0xff]  ;;  %v1944_v9 = vpack.c.bf16 %v736_v5, %v734_v1 }
 0x1de   :  { %v1895_v18 = vpack.c.bf16 %v575_v17, %v574_v8  ;;  %v742_v17 = vld [vmem:[%s2823_s1 + $0x118] sm:$0xff]  ;;  %v857_v5 = vld [vmem:[%s2826_s2 + $0x10] sm:$0xff] }
 0x1df   :  { %v188_v13 = vmul.f32 %v1251_v10, %v180_v11  ;;  %v1946_v10 = vpack.c.bf16 %v741_v7, %v739_v6  ;;  %v738_v11 = vld [vmem:[%s2823_s1 + $0x98] sm:$0xff]  ;;  %v875_v7 = vld [vmem:[%s2826_s2 + $0xa0] sm:$0xff] }
 0x1e0   :  { %v858_v6 = vld [vmem:[%s2826_s2 + $0x18] sm:$0xff] }
 0x1e1   :  { %v196_v14 = vadd.f32 %v1252_v12, %v188_v13  ;;  %v740_v12 = vld [vmem:[%s2823_s1 + $0xd8] sm:$0xff]  ;;  %v743_v13 = vld [vmem:[%s2823_s1 + $0x120] sm:$0xff] }
 0x1e3   :  { %490 = vmatmul.mubr.f32.vlgmr.msra.gmra.mrb[4].mxu0 %v196_v14  ;;  %1613 = vmatmul.mubr.f32.vlgmr.msra.gmra.mrb[4].mxu1 %v196_v14  ;;  %v745_v14 = vld [vmem:[%s2823_s1 + $0x160] sm:$0xff] }
 0x1e4   :  { %1647 = vmatprep.mubr.msk.f32.mxu0 %vm2081_vm0, %v2082_v4  ;;  %1682 = vmatprep.mubr.msk.f32.mxu1 %vm2081_vm0, %v2082_v4  ;;  %v1950_v8 = vpack.c.bf16 %v745_v14, %v743_v13  ;;  %v860_v13 = vld [vmem:[%s2826_s2 + $0x28] sm:$0xff]  ;;  %v877_v14 = vld [vmem:[%s2826_s2 + $0xb0] sm:$0xff] }
 0x1e5   :  { %1896 = vmatpush3.bf16.msra.mxu0 %v1895_v18  ;;  %1920 = vmatpush3.bf16.msra.mxu1 %v1895_v18  ;;  %v744_v18 = vld [vmem:[%s2823_s1 + $0x158] sm:$0xff] }
 0x1e6   :  { %1897 = vmatprep.subr.bf16.mxu0 %v2080_v0  ;;  %1921 = vmatprep.subr.bf16.mxu1 %v2080_v0 }
 0x1e9   :  { %1899 = vmatpush3.bf16.msra.mxu0 %v1898_v21  ;;  %1923 = vmatpush3.bf16.msra.mxu1 %v1898_v21  ;;  %v1952_v21 = vpack.c.bf16 %v744_v18, %v742_v17  ;;  %v861_v18 = vld [vmem:[%s2826_s2 + $0x30] sm:$0xff] }
 0x1ea   :  { %1900 = vmatprep.subr.bf16.mxu0 %v2080_v0  ;;  %1924 = vmatprep.subr.bf16.mxu1 %v2080_v0 }
 0x1ed   :  { %1902 = vmatpush3.bf16.msra.mxu0 %v1901_v24  ;;  %1926 = vmatpush3.bf16.msra.mxu1 %v1901_v24  ;;  %v748_v24 = vld [vmem:[%s2823_s1 + $0x1d8] sm:$0xff] }
 0x1ee   :  { %1903 = vmatprep.subr.bf16.mxu0 %v2080_v0  ;;  %1927 = vmatprep.subr.bf16.mxu1 %v2080_v0  ;;  %v1956_v25 = vpack.c.bf16 %v748_v24, %v746_v23  ;;  %v863_v24 = vld [vmem:[%s2826_s2 + $0x40] sm:$0xff] }
 0x1ef   :  { %v2442_v15 = vpop.f32.mrb[2].mxu1 }
 0x1f0   :  { %v1579_v16 = vpop.f32.mrb[3].mxu1 }
 0x1f1   :  { %1905 = vmatpush3.bf16.msra.mxu0 %v1904_v27  ;;  %1929 = vmatpush3.bf16.msra.mxu1 %v1904_v27  ;;  %v1948_v16 = vpack.c.bf16 %v740_v12, %v738_v11  ;;  %v859_v12 = vld [vmem:[%s2826_s2 + $0x20] sm:$0xff] }
 0x1f2   :  { %1906 = vmatprep.subr.bf16.mxu0 %v2080_v0  ;;  %1930 = vmatprep.subr.bf16.mxu1 %v2080_v0 }
 0x1f5   :  { %1908 = vmatpush3.bf16.msra.mxu0 %v1907_v30  ;;  %1932 = vmatpush3.bf16.msra.mxu1 %v1907_v30  ;;  %v751_v30 = vld [vmem:[%s2823_s1 + $0x220] sm:$0xff] }
 0x1f6   :  { %1909 = vmatprep.subr.bf16.mxu0 %v2080_v0  ;;  %1933 = vmatprep.subr.bf16.mxu1 %v2080_v0  ;;  %v1958_v32 = vpack.c.bf16 %v753_v31, %v751_v30  ;;  %v865_v31 = vld [vmem:[%s2826_s2 + $0x50] sm:$0xff] }
 0x1f9   :  { %1911 = vmatpush3.bf16.msra.mxu0 %v1910_v33  ;;  %1935 = vmatpush3.bf16.msra.mxu1 %v1910_v33  ;;  %v750_v33 = vld [vmem:[%s2823_s1 + $0x218] sm:$0xff] }
 0x1fa   :  { %1912 = vmatprep.subr.bf16.mxu0 %v2080_v0  ;;  %1936 = vmatprep.subr.bf16.mxu1 %v2080_v0  ;;  %v1960_v35 = vpack.c.bf16 %v752_v34, %v750_v33 }
 0x1fd   :  { %1914 = vmatpush3.bf16.msra.mxu0 %v1913_v36  ;;  %1938 = vmatpush3.bf16.msra.mxu1 %v1913_v36  ;;  %v755_v36 = vld [vmem:[%s2823_s1 + $0x2a0] sm:$0xff] }
 0x1fe   :  { %1915 = vmatprep.subr.bf16.mxu0 %v2080_v0  ;;  %1939 = vmatprep.subr.bf16.mxu1 %v2080_v0  ;;  %v1962_v38 = vpack.c.bf16 %v757_v37, %v755_v36 }
 0x201   :  { %1917 = vmatpush3.bf16.msra.mxu0 %v1916_v39  ;;  %1941 = vmatpush3.bf16.msra.mxu1 %v1916_v39  ;;  %v754_v39 = vld [vmem:[%s2823_s1 + $0x298] sm:$0xff] }
 0x202   :  { %1943 = vmatprep.subr.bf16.mxu0 %v1942_v3  ;;  %v1964_v43 = vpack.c.bf16 %v756_v40, %v754_v39  ;;  %v1978_v3 = vpack.c.bf16 %v874_v63, %v873_v62  ;;  %v883_v39 = vld [vmem:[%s2826_s2 + $0xe0] sm:$0xff]  ;;  %v884_v40 = vld [vmem:[%s2826_s2 + $0xe8] sm:$0xff] }
 0x2b6   :  { %v491_v45 = vpop.f32.mrb[4].mxu0  ;;  %v562_v46 = vpop.f32.mrb[4].mxu1 }
 0x2b7   :  { %v563_v47 = vadd.f32 %v562_v46, %v421_v44  ;;  %v493_v48 = vpop.f32.mrb[5].mxu0  ;;  %v1614_v49 = vpop.f32.mrb[5].mxu1  ;;  %v492_v59 = vadd.f32 %v491_v45, %v413_v56  ;;  %v761_v44 = vld [vmem:[%s2823_s1 + $0x360] sm:$0xff]  ;;  %v758_v45 = vld [vmem:[%s2823_s1 + $0x318] sm:$0xff] }
 0x2b8   :  { %v494_v57 = vadd.f32 %v493_v48, %v417_v55  ;;  %v760_v46 = vld [vmem:[%s2823_s1 + $0x358] sm:$0xff]  ;;  %v763_v48 = vld [vmem:[%s2823_s1 + $0x3a0] sm:$0xff] }
 0x2b9   :  { %v1253_v50 = vmul.f32 -1.442695, %v563_v47  ;;  %v1966_v47 = vpack.c.bf16 %v761_v44, %v759_v42  ;;  %v765_v49 = vld [vmem:[%s2823_s1 + $0x3e0] sm:$0xff]  ;;  %v764_v55 = vld [vmem:[%s2823_s1 + $0x3d8] sm:$0xff]  ;;  %v1998_v42 = vpack.c.bf16 %v884_v40, %v883_v39 }
 0x2bb   :  { %2070 = vpow2.f32 %v1253_v50  ;;  %v1968_v50 = vpack.c.bf16 %v760_v46, %v758_v45  ;;  %v885_v45 = vld [vmem:[%s2826_s2 + $0xf0] sm:$0xff]  ;;  %v886_v46 = vld [vmem:[%s2826_s2 + $0xf8] sm:$0xff] }
 0x2c5   :  { %v2071_v51 = vpop.eup %2070 }
 0x2c6   :  { %v569_v52 = vadd.f32 1.0, %v2071_v51  ;;  %v1970_v51 = vpack.c.bf16 %v765_v49, %v763_v48  ;;  %v869_v48 = vld [vmem:[%s2826_s2 + $0x70] sm:$0xff]  ;;  %v870_v49 = vld [vmem:[%s2826_s2 + $0x78] sm:$0xff] }
 0x2c8   :  { %2072 = vrcp.f32 %v569_v52  ;;  %v762_v52 = vld [vmem:[%s2823_s1 + $0x398] sm:$0xff] }
 0x2c9   :  { %v1972_v56 = vpack.c.bf16 %v764_v55, %v762_v52  ;;  %v2728_v52 = vld [vmem:[%s2827_s3 + $0x8] sm:$0xff]  ;;  %v2733_v55 = vld [vmem:[%s2827_s3 + $0x10] sm:$0xff] }
 0x2d2   :  { %v2073_v58 = vpop.eup %2072 }
 0x2d3   :  { %v572_v60 = vmul.f32 %v2073_v58, %v494_v57  ;;  %v871_v57 = vld [vmem:[%s2826_s2 + $0x80] sm:$0xff]  ;;  %v872_v58 = vld [vmem:[%s2826_s2 + $0x88] sm:$0xff] }
 0x2d5   :  { %v573_v61 = vadd.f32 %v572_v60, %v492_v59  ;;  %v855_v59 = vld [vmem:[%s2826_s2] sm:$0xff]  ;;  %v1974_v60 = vpack.c.bf16 %v872_v58, %v871_v57  ;;  %v2742_v58 = vld [vmem:[%s2827_s3 + $0x18] sm:$0xff] }
 0x2d7   :  { %1648 = vmatmul.mubr.f32.vlgmr.msra.gmra.mrb[6].mxu0 %v573_v61  ;;  %1975 = vmatprep.subr.bf16.mxu1 %v1974_v60  ;;  %v2752_v60 = vld [vmem:[%s2827_s3 + $0x28] sm:$0xff] }
 0x2d8   :  { %842 = vmatprep.mubr.f32.mxu0 %v2082_v4  ;;  %1945 = vmatpush1.bf16.msra.mxu0 %v1944_v9  ;;  %v876_v9 = vld [vmem:[%s2826_s2 + $0xa8] sm:$0xff] }
 0x2d9   :  { %1947 = vmatprep.subr.bf16.mxu0 %v1946_v10  ;;  %v1980_v10 = vpack.c.bf16 %v858_v6, %v857_v5  ;;  %v1982_v11 = vpack.c.bf16 %v876_v9, %v875_v7  ;;  %v2053_v5 = vpack.i.bf16 %v2742_v58, %v2733_v55  ;;  %v766_v9 = vld [vmem:[%s2825_s4 + $0x3] sm:$0x3] }
 0x2dc   :  { %1949 = vmatpush1.bf16.msra.mxu0 %v1948_v16  ;;  %v878_v16 = vld [vmem:[%s2826_s2 + $0xb8] sm:$0xff] }
 0x2dd   :  { %1951 = vmatprep.subr.bf16.mxu0 %v1950_v8  ;;  %v1984_v8 = vpack.c.bf16 %v860_v13, %v859_v12  ;;  %v1986_v17 = vpack.c.bf16 %v878_v16, %v877_v14 }
 0x2e0   :  { %1953 = vmatpush1.bf16.msra.mxu0 %v1952_v21  ;;  %v880_v21 = vld [vmem:[%s2826_s2 + $0xc8] sm:$0xff] }
 0x2e1   :  { %1955 = vmatprep.subr.bf16.mxu0 %v1954_v22  ;;  %v1988_v22 = vpack.c.bf16 %v862_v19, %v861_v18  ;;  %v1990_v23 = vpack.c.bf16 %v880_v21, %v879_v20 }
 0x2e4   :  { %1957 = vmatpush1.bf16.msra.mxu0 %v1956_v25  ;;  %v864_v25 = vld [vmem:[%s2826_s2 + $0x48] sm:$0xff] }
 0x2e5   :  { %1959 = vmatprep.subr.bf16.mxu0 %v1958_v32  ;;  %v866_v32 = vld [vmem:[%s2826_s2 + $0x58] sm:$0xff] }
 0x2e6   :  { %v1996_v33 = vpack.c.bf16 %v866_v32, %v865_v31 }
 0x2e8   :  { %1961 = vmatpush1.bf16.msra.mxu0 %v1960_v35 }
 0x2e9   :  { %1963 = vmatprep.subr.bf16.mxu0 %v1962_v38 }
 0x2ec   :  { %1965 = vmatpush1.bf16.msra.mxu0 %v1964_v43  ;;  %v867_v43 = vld [vmem:[%s2826_s2 + $0x60] sm:$0xff] }
 0x2ed   :  { %1967 = vmatprep.subr.bf16.mxu0 %v1966_v47  ;;  %v2002_v47 = vpack.c.bf16 %v886_v46, %v885_v45  ;;  %v350_v46 = vadd.f32 1e-05, %v2442_v15 }
 0x2ef   :  { %vm355_vm4 = vcmp.eq.f32.partialorder %v350_v46, inf  ;;  %vm357_vm5 = vcmp.eq.f32.partialorder %v350_v46, 0.0 }
 0x2f0   :  { %1969 = vmatpush1.bf16.msra.mxu0 %v1968_v50  ;;  %v2004_v50 = vpack.c.bf16 %v870_v49, %v869_v48 }
 0x2f1   :  { %1971 = vmatprep.subr.bf16.mxu0 %v1970_v51  ;;  %v2723_v51 = vld [vmem:[%s2827_s3] sm:$0xff] }
 0x2f2   :  { %v2031_v57 = vpack.c.bf16 %v2728_v52, %v2723_v51 }
 0x2f4   :  { %1973 = vmatpush1.bf16.msra.mxu0 %v1972_v56  ;;  %v2048_v56 = vpack.i.bf16 %v2728_v52, %v2723_v51  ;;  %v1258_v51 = vld [vmem:[%s2825_s4 + $0x8] ss:$0 sm:$0xff] }
 0x2f5   :  { %2006 = vmatprep.subr.bf16.mxu0 %v2080_v0 }
 0x2f6   :  { %2049 = vrot.lane.b32.xlu0 %v2048_v56, %s2083_s21 }
 0x2fa   :  { %2054 = vrot.lane.b32.xlu0 %v2053_v5, %s2083_s21 }
 0x368   :  { %v2050_v12 = vpop.permute.xlu0 %2049 }
 0x369   :  { %v2052_v13 = vunpack.i.h.bf16 %v2050_v12  ;;  %v2051_v14 = vunpack.i.l.bf16 %v2050_v12 }
 0x36b   :  { %v2007_v19 = vpack.c.bf16 %v2052_v13, %v2051_v14 }
 0x36c   :  { %v2055_v21 = vpop.permute.xlu0 %2054 }
 0x3aa   :  { %v656_v26 = vpop.f32.mrb[6].mxu0 }
 0x3ab   :  { %v2567_v27 = vsub.f32 %v573_v61, %v656_v26  ;;  %v1649_v28 = vpop.f32.mrb[7].mxu0  ;;  %v856_v61 = vld [vmem:[%s2826_s2 + $0x8] sm:$0xff]  ;;  %v881_v26 = vld [vmem:[%s2826_s2 + $0xd0] sm:$0xff] }
 0x3ac   :  { %v1976_v1 = vpack.c.bf16 %v856_v61, %v855_v59  ;;  %v882_v28 = vld [vmem:[%s2826_s2 + $0xd8] sm:$0xff]  ;;  %v2747_v59 = vld [vmem:[%s2827_s3 + $0x20] sm:$0xff]  ;;  %v2034_v61 = vpack.c.bf16 %v2742_v58, %v2733_v55 }
 0x3ad   :  { %v661_v29 = vmul.f32 %v2567_v27, %v2567_v27  ;;  %v1994_v30 = vpack.c.bf16 %v882_v28, %v881_v26  ;;  %v2058_v62 = vpack.i.bf16 %v2752_v60, %v2747_v59  ;;  %v2037_v63 = vpack.c.bf16 %v2752_v60, %v2747_v59 }
 0x3ae   :  { %v358_v59 = vand.u32 2147483648, %v350_v46 }
 0x3af   :  { %1683 = vmatmul.mubr.f32.vlgmr.msra.gmra.mrb[6].mxu1 %v661_v29  ;;  %v1992_v29 = vpack.c.bf16 %v864_v25, %v863_v24  ;;  %2059 = vrot.lane.b32.xlu1 %v2058_v62, %s2083_s21  ;;  %v2057_v24 = vunpack.i.h.bf16 %v2055_v21  ;;  %v2056_v25 = vunpack.i.l.bf16 %v2055_v21 }
 0x3b0   :  { %1977 = vmatpush3.bf16.msra.mxu1 %v1976_v1  ;;  %v2763_v1 = vld [vmem:[%s2827_s3 + $0x30] sm:$0xff] }
 0x3b1   :  { %1979 = vmatprep.subr.bf16.mxu1 %v1978_v3  ;;  %v2768_v3 = vld [vmem:[%s2827_s3 + $0x38] sm:$0xff] }
 0x3b2   :  { %v2040_v6 = vpack.c.bf16 %v2768_v3, %v2763_v1  ;;  %v2063_v7 = vpack.i.bf16 %v2768_v3, %v2763_v1 }
 0x3b4   :  { %1981 = vmatpush3.bf16.msra.mxu1 %v1980_v10  ;;  %2064 = vrot.lane.b32.xlu1 %v2063_v7, %s2083_s21  ;;  %v771_v10 = vrot.slane %v766_v9, %v412_v54 }
 0x3b5   :  { %1983 = vmatprep.subr.bf16.mxu1 %v1982_v11  ;;  %v775_v11 = vrot.slane %v766_v9, %v416_v53  ;;  %v2010_v53 = vpack.c.bf16 %v2057_v24, %v2056_v25 }
 0x3b8   :  { %1985 = vmatpush3.bf16.msra.mxu1 %v1984_v8 }
 0x3b9   :  { %1987 = vmatprep.subr.bf16.mxu1 %v1986_v17 }
 0x3bc   :  { %1989 = vmatpush3.bf16.msra.mxu1 %v1988_v22 }
 0x3bd   :  { %1991 = vmatprep.subr.bf16.mxu1 %v1990_v23 }
 0x3c0   :  { %1993 = vmatpush3.bf16.msra.mxu1 %v1992_v29 }
 0x3c1   :  { %1995 = vmatprep.subr.bf16.mxu1 %v1994_v30 }
 0x3c4   :  { %1997 = vmatpush3.bf16.msra.mxu1 %v1996_v33 }
 0x3c5   :  { %1999 = vmatprep.subr.bf16.mxu1 %v1998_v42 }
 0x421   :  { %v2060_v16 = vpop.permute.xlu1 %2059 }
 0x422   :  { %v2062_v22 = vunpack.i.h.bf16 %v2060_v16  ;;  %v2061_v26 = vunpack.i.l.bf16 %v2060_v16 }
 0x424   :  { %v2013_v30 = vpack.c.bf16 %v2062_v22, %v2061_v26 }
 0x426   :  { %v2065_v41 = vpop.permute.xlu1 %2064 }
 0x427   :  { %v2067_v31 = vunpack.i.h.bf16 %v2065_v41  ;;  %v2066_v32 = vunpack.i.l.bf16 %v2065_v41 }
 0x429   :  { %v2016_v33 = vpack.c.bf16 %v2067_v31, %v2066_v32 }
 0x482   :  { %v728_v34 = vpop.f32.mrb[6].mxu1 }
 0x483   :  { %v729_v35 = vadd.f32 1e-05, %v728_v34  ;;  %v1684_v36 = vpop.f32.mrb[7].mxu1 }
 0x485   :  { %2074 = vrsqrt.f32 %v729_v35  ;;  %v1254_v35 = vld [vmem:[%s2825_s4 + $0x7] ss:$0 sm:$0xff] }
 0x486   :  { %1155 = vrot.lane.b32.xlu0 %v1254_v35, %s2084_s25  ;;  %1239 = vrot.lane.b32.xlu1 %v1254_v35, %s2085_s26 }
 0x48f   :  { %v2075_v37 = vpop.eup %2074 }
 0x490   :  { %v733_v38 = vmul.f32 %v2075_v37, %v2567_v27  ;;  %v868_v27 = vld [vmem:[%s2826_s2 + $0x68] sm:$0xff] }
 0x491   :  { %v2000_v44 = vpack.c.bf16 %v868_v27, %v867_v43 }
 0x492   :  { %843 = vmatmul.mubr.f32.vlgmr.msra.gmra.mrb[8].mxu0 %v733_v38 }
 0x493   :  { %1701 = vmatprep.mubr.msk.f32.mxu0 %vm2081_vm0, %v2082_v4  ;;  %2001 = vmatpush3.bf16.msra.mxu1 %v2000_v44 }
 0x494   :  { %2003 = vmatprep.subr.bf16.mxu1 %v2002_v47  ;;  %2008 = vmatpush3.bf16.msra.mxu0 %v2007_v19 }
 0x495   :  { %2009 = vmatprep.subr.bf16.mxu0 %v2080_v0 }
 0x497   :  { %2005 = vmatpush3.bf16.msra.mxu1 %v2004_v50 }
 0x498   :  { %2018 = vmatprep.subr.bf16.mxu1 %v2080_v0  ;;  %2011 = vmatpush3.bf16.msra.mxu0 %v2010_v53 }
 0x499   :  { %2012 = vmatprep.subr.bf16.mxu0 %v2080_v0 }
 0x49c   :  { %2014 = vmatpush3.bf16.msra.mxu0 %v2013_v30 }
 0x49d   :  { %2015 = vmatprep.subr.bf16.mxu0 %v2080_v0 }
 0x4a0   :  { %2017 = vmatpush3.bf16.msra.mxu0 %v2016_v33 }
 0x4a1   :  { %2030 = vmatprep.subr.bf16.mxu0 %v2080_v0 }
 0x4f8   :  { %v1156_v48 = vpop.permute.xlu0 %1155  ;;  %v1240_v56 = vpop.permute.xlu1 %1239 }
 0x565   :  { %v844_v8 = vpop.f32.mrb[8].mxu0 }
 0x566   :  { %v845_v17 = vadd.f32 %v844_v8, %v771_v10  ;;  %v846_v18 = vpop.f32.mrb[9].mxu0 }
 0x567   :  { %v847_v20 = vadd.f32 %v846_v18, %v775_v11 }
 0x568   :  { %v851_v23 = vmul.f32 0.1, %v845_v17  ;;  %vm849_vm1 = vcmp.gt.f32.partialorder %v845_v17, 0.0 }
 0x569   :  { %v852_v54 = vmul.f32 0.1, %v847_v20  ;;  %vm850_vm2 = vcmp.gt.f32.partialorder %v847_v20, 0.0 }
 0x56a   :  { %v853_v29 = vsel %vm849_vm1, %v845_v17, %v851_v23 }
 0x56b   :  { %v854_v28 = vsel %vm850_vm2, %v847_v20, %v852_v54 }
 0x56c   :  { %958 = vmatprep.mubr.f32.mxu1 %v854_v28 }
 0x56d   :  { %959 = vmatmul.mubr.f32.vlgmr.msra.gmra.mrb[8].mxu1 %v853_v29 }
 0x56e   :  { %2020 = vmatpush3.bf16.msra.mxu1 %v2007_v19  ;;  %1720 = vmatprep.mubr.msk.f32.mxu1 %vm2081_vm0, %v2082_v4 }
 0x56f   :  { %2021 = vmatprep.subr.bf16.mxu1 %v2080_v0 }
 0x572   :  { %2023 = vmatpush3.bf16.msra.mxu1 %v2010_v53 }
 0x573   :  { %2024 = vmatprep.subr.bf16.mxu1 %v2080_v0 }
 0x576   :  { %2026 = vmatpush3.bf16.msra.mxu1 %v2013_v30 }
 0x577   :  { %2027 = vmatprep.subr.bf16.mxu1 %v2080_v0 }
 0x57a   :  { %2029 = vmatpush3.bf16.msra.mxu1 %v2016_v33 }
 0x640   :  { %v1410_v34 = vpop.f32.mrb[8].mxu1 }
 0x641   :  { %v1411_v36 = vpop.f32.mrb[9].mxu1 }
 0x642   :  { %v1412_v37 = vadd.f32 %v1411_v36, %v1410_v34 }
 0x644   :  { %v961_v38 = vadd.f32 %v1412_v37, %v1254_v35 }
 0x646   :  { %1702 = vmatmul.mubr.msk.f32.vlgmr.msra.gmra.mrb[10].mxu0 %vm1004_vm3, %v961_v38 }
 0x647   :  { %2032 = vmatpush3.bf16.msra.mxu0 %v2031_v57  ;;  %1739 = vmatprep.mubr.msk.f32.mxu0 %vm2081_vm0, %v2082_v4 }
 0x648   :  { %2033 = vmatprep.subr.bf16.mxu0 %v2080_v0 }
 0x64b   :  { %2035 = vmatpush3.bf16.msra.mxu0 %v2034_v61 }
 0x64c   :  { %2036 = vmatprep.subr.bf16.mxu0 %v2080_v0 }
 0x64f   :  { %2038 = vmatpush3.bf16.msra.mxu0 %v2037_v63 }
 0x650   :  { %2039 = vmatprep.subr.bf16.mxu0 %v2080_v0 }
 0x653   :  { %2041 = vmatpush3.bf16.msra.mxu0 %v2040_v6 }
 0x719   :  { %v1074_v39 = vpop.f32.mrb[10].mxu0 }
 0x71a   :  { %v1078_v4 = vsub.f32 %v961_v38, %v1074_v39  ;;  %v1703_v40 = vpop.f32.mrb[11].mxu0 }
 0x71c   :  { %v1079_v42 = vmul.f32 %v1078_v4, %v1078_v4 }
 0x71e   :  { %1721 = vmatmul.mubr.msk.f32.vlgmr.msra.gmra.mrb[10].mxu1 %vm1004_vm3, %v1079_v42 }
 0x7f1   :  { %v1149_v43 = vpop.f32.mrb[10].mxu1 }
 0x7f2   :  { %v1150_v27 = vadd.f32 1e-05, %v1149_v43  ;;  %v1722_v44 = vpop.f32.mrb[11].mxu1 }
 0x7f4   :  { %2076 = vrsqrt.f32 %v1150_v27 }
 0x7f5   :  { %2078 = vrsqrt.f32 %v350_v46 }
 0x7fe   :  { %v2077_v45 = vpop.eup %2076 }
 0x7ff   :  { %v1154_v0 = vmul.f32 %v2077_v45, %v1078_v4  ;;  %v2079_v47 = vpop.eup %2078 }
 0x800   :  { %v354_v49 = vmul.f32 %v2079_v47, %v350_v46 }
 0x801   :  { %1740 = vmatmul.mubr.msk.f32.vlgmr.msra.gmra.mrb[12].mxu0 %vm1004_vm3, %v1154_v0 }
 0x802   :  { %v356_v57 = vsel %vm355_vm4, %v350_v46, %v354_v49 }
 0x803   :  { %v359_v61 = vsel %vm357_vm5, %v358_v59, %v356_v57 }
 0x8d4   :  { %v1227_v50 = vpop.f32.mrb[12].mxu0 }
 0x8d5   :  { %v1228_v52 = vadd.f32 %v1227_v50, %v1156_v48  ;;  %v1741_v55 = vpop.f32.mrb[13].mxu0 }
 0x8d7   :  { %v1238_v58 = vsub.f32 %v1228_v52, %v1258_v51 }
 0x8d9   :  { %v1242_v60 = vmul.f32 %v1240_v56, %v1238_v58 }
 0x8db   :  { %v1243_v15 = vmul.f32 %v1242_v60, %v359_v61 }
 0x8dd   :  { %v1244_v62 = vadd.f32 %v1243_v15, %v2429_v2 }
 0x8df   :  { %1246 = vst.msk [vmem:[%s2828_s5] sm:$0xff] %vm1245_vm6, %v1244_v62 }

</bundles_post_ra>
